<compile_context>
chip_gen: v6e
topology: v6e:2x2x1
jax: 0.10.0
libtpu: 0.0.40
codegen_flags: <defaults>
</compile_context>

<pallas_src>
import jax
import jax.numpy as jnp
from jax.experimental import pallas as pl
from jax.experimental.pallas import tpu as pltpu

SEQ = 8        # module's self.batch_size (really the sequence length)
INPUT = 256    # LSTM input size   (2048 in the original)
HIDDEN = 128   # LSTM hidden size  (1024 in the original)
FC1 = 64       # fc1 out           (512  in the original)
FC2 = 32       # fc2 out           (256  in the original)
FC3 = 1        # fc3 out


def temporal_kernel(x_ref, w_ih_ref, w_hh_ref, b_ref,
                    fc1_w_ref, fc1_b_ref, ln1_g_ref, ln1_b_ref,
                    fc2_w_ref, fc2_b_ref, ln2_g_ref, ln2_b_ref,
                    fc3_w_ref, fc3_b_ref, out_ref, gx_ref):
    H = HIDDEN
    seq = x_ref.shape[0]

    # ----- hoisted input projection: one (SEQ, 4H) MXU pass, off the serial chain -----
    x_bf = x_ref[...].astype(jnp.bfloat16)                        # (SEQ, INPUT)
    gx_ref[...] = (jnp.dot(x_bf, w_ih_ref[...],                   # (SEQ, 4H) f32
                           preferred_element_type=jnp.float32)
                   + b_ref[...])

    w_hh = w_hh_ref[...]          # (H, 4H) bf16, kept resident across the loop

    # ----- LSTM recurrence over the sequence (batch = 1) -----
    # Gate order is [i, f, o, g] (pre-permuted offline from PyTorch's
    # [i, f, g, o]) so sigmoid fuses over the first 3H lanes.
    def step(t, carry):
        h, c = carry
        gates = (gx_ref[pl.ds(t, 1), :]
                 + jnp.dot(h.astype(jnp.bfloat16), w_hh,
                           preferred_element_type=jnp.float32))   # (1, 4H)
        sig = jax.nn.sigmoid(gates[:, :3 * H])                    # i | f | o
        i = sig[:, 0 * H:1 * H]
        f = sig[:, 1 * H:2 * H]
        o = sig[:, 2 * H:3 * H]
        g = jnp.tanh(gates[:, 3 * H:4 * H])
        c_new = f * c + i * g
        h_new = o * jnp.tanh(c_new)
        return h_new, c_new

    h0 = jnp.zeros((1, H), jnp.float32)
    c0 = jnp.zeros((1, H), jnp.float32)
    h_last, _ = jax.lax.fori_loop(0, seq, step, (h0, c0), unroll=True)
    # x = lstm_out[-1, :, :]  == final hidden state, shape (1, H)

    # ----- MLP head -----
    def layernorm(y, gamma, beta, eps=1e-5):
        mu = jnp.mean(y, axis=-1, keepdims=True)
        var = jnp.mean((y - mu) ** 2, axis=-1, keepdims=True)
        return (y - mu) * jax.lax.rsqrt(var + eps) * gamma + beta

    def leaky_relu(y, slope=0.01):    # F.leaky_relu default negative_slope
        return jnp.where(y > 0, y, slope * y)

    def mm(a, w_ref):                 # bf16 MXU inputs, f32 accumulation
        return jnp.dot(a.astype(jnp.bfloat16), w_ref[...],
                       preferred_element_type=jnp.float32)

    y = mm(h_last, fc1_w_ref) + fc1_b_ref[...]
    y = leaky_relu(layernorm(y, ln1_g_ref[...], ln1_b_ref[...]))

    y = mm(y, fc2_w_ref) + fc2_b_ref[...]
    y = leaky_relu(layernorm(y, ln2_g_ref[...], ln2_b_ref[...]))

    y = jnp.tanh(mm(y, fc3_w_ref) + fc3_b_ref[...])
    out_ref[...] = y                                              # (1, 1)


def temporal_forward(x, kp):
    """kp: kernel-layout params from prepare_kernel_params()."""
    # Glue: the module does x.view(batch_size, 1, 2048); squeeze the batch=1 dim.
    x2d = x.reshape(SEQ, INPUT).astype(jnp.float32)
    args = (x2d,
            kp["w_ih"], kp["w_hh"], kp["b"],
            kp["fc1_w"], kp["fc1_b"], kp["ln1_g"], kp["ln1_b"],
            kp["fc2_w"], kp["fc2_b"], kp["ln2_g"], kp["ln2_b"],
            kp["fc3_w"], kp["fc3_b"])
    vmem = pl.BlockSpec(memory_space=pltpu.MemorySpace.VMEM)
    return pl.pallas_call(
        temporal_kernel,
        out_shape=jax.ShapeDtypeStruct((1, FC3), jnp.float32),
        in_specs=[vmem] * len(args),
        out_specs=vmem,
        scratch_shapes=[pltpu.VMEM((SEQ, 4 * HIDDEN), jnp.float32)],
    )(*args)


# ---------------------------------------------------------------------------
# Parameter construction / offline preparation
# ---------------------------------------------------------------------------
def make_params(key):
    """f32 parameters in PyTorch layout (gate order [i, f, g, o], fused bias)."""
    ks = jax.random.split(key, 12)
    s = 0.05
    return {
        "w_ih": s * jax.random.normal(ks[0], (INPUT, 4 * HIDDEN), jnp.float32),
        "w_hh": s * jax.random.normal(ks[1], (HIDDEN, 4 * HIDDEN), jnp.float32),
        "b":    s * jax.random.normal(ks[2], (1, 4 * HIDDEN), jnp.float32),
        "fc1_w": s * jax.random.normal(ks[3], (HIDDEN, FC1), jnp.float32),
        "fc1_b": s * jax.random.normal(ks[4], (1, FC1), jnp.float32),
        "ln1_g": 1.0 + s * jax.random.normal(ks[5], (1, FC1), jnp.float32),
        "ln1_b": s * jax.random.normal(ks[6], (1, FC1), jnp.float32),
        "fc2_w": s * jax.random.normal(ks[7], (FC1, FC2), jnp.float32),
        "fc2_b": s * jax.random.normal(ks[8], (1, FC2), jnp.float32),
        "ln2_g": 1.0 + s * jax.random.normal(ks[9], (1, FC2), jnp.float32),
        "ln2_b": s * jax.random.normal(ks[10], (1, FC2), jnp.float32),
        "fc3_w": s * jax.random.normal(ks[11], (FC2, FC3), jnp.float32),
        "fc3_b": jnp.zeros((1, FC3), jnp.float32),
    }


def _ifgo_to_ifog(w):
    """Reorder stacked-gate columns [i, f, g, o] (PyTorch) -> [i, f, o, g]."""
    i, f, g, o = jnp.split(w, 4, axis=-1)
    return jnp.concatenate([i, f, o, g], axis=-1)


def prepare_kernel_params(p):
    """Offline transform: gate reorder + bf16 weight matrices (biases/LN stay f32)."""
    bf = jnp.bfloat16
    return {
        "w_ih": _ifgo_to_ifog(p["w_ih"]).astype(bf),
        "w_hh": _ifgo_to_ifog(p["w_hh"]).astype(bf),
        "b":    _ifgo_to_ifog(p["b"]),
        "fc1_w": p["fc1_w"].astype(bf), "fc1_b": p["fc1_b"],
        "ln1_g": p["ln1_g"], "ln1_b": p["ln1_b"],
        "fc2_w": p["fc2_w"].astype(bf), "fc2_b": p["fc2_b"],
        "ln2_g": p["ln2_g"], "ln2_b": p["ln2_b"],
        "fc3_w": p["fc3_w"].astype(bf), "fc3_b": p["fc3_b"],
    }


# ---------------------------------------------------------------------------
# Pure-JAX reference: same math as the PyTorch module in eval mode (PyTorch
# [i,f,g,o] gate order), with the kernel's intentional bf16 weight/matmul-input
# quantization mirrored so the numeric comparison stays tight.
# ---------------------------------------------------------------------------
def temporal_reference(x, p):
    bf = lambda a: a.astype(jnp.bfloat16)
    dot = lambda a, w: jnp.dot(bf(a), bf(w), preferred_element_type=jnp.float32)
    xs = x.reshape(SEQ, INPUT).astype(jnp.float32)
    H = HIDDEN
    h = jnp.zeros((1, H), jnp.float32)
    c = jnp.zeros((1, H), jnp.float32)
    for t in range(SEQ):
        gates = dot(xs[t:t + 1], p["w_ih"]) + dot(h, p["w_hh"]) + p["b"]
        i = jax.nn.sigmoid(gates[:, 0 * H:1 * H])
        f = jax.nn.sigmoid(gates[:, 1 * H:2 * H])
        g = jnp.tanh(gates[:, 2 * H:3 * H])
        o = jax.nn.sigmoid(gates[:, 3 * H:4 * H])
        c = f * c + i * g
        h = o * jnp.tanh(c)

    def ln(y, g_, b_, eps=1e-5):
        mu = jnp.mean(y, -1, keepdims=True)
        var = jnp.mean((y - mu) ** 2, -1, keepdims=True)
        return (y - mu) * jax.lax.rsqrt(var + eps) * g_ + b_

    lrelu = lambda y: jnp.where(y > 0, y, 0.01 * y)
    y = lrelu(ln(dot(h, p["fc1_w"]) + p["fc1_b"], p["ln1_g"], p["ln1_b"]))
    y = lrelu(ln(dot(y, p["fc2_w"]) + p["fc2_b"], p["ln2_g"], p["ln2_b"]))
    return jnp.tanh(dot(y, p["fc3_w"]) + p["fc3_b"])


if __name__ == "__main__":
    key = jax.random.PRNGKey(0)
    kx, kp = jax.random.split(key)
    # Input the way the module receives it: anything that views to (SEQ, 1, INPUT).
    x = jax.random.normal(kx, (SEQ, 1, INPUT), jnp.float32)
    params = make_params(kp)
    kparams = prepare_kernel_params(params)

    out = temporal_forward(x, kparams)
    out = jax.block_until_ready(out)

    ref = temporal_reference(x, params)
    assert out.shape == (1, 1)
    assert jnp.allclose(out, ref, rtol=5e-3, atol=5e-3), (out, ref)

    print("KERNEL_OK")
</pallas_src>

<mosaic_0001>
module attributes {stable_mosaic.version = 11 : i64} {
  func.func @temporal_kernel(%arg0: memref<8x256xf32, #tpu.memory_space<vmem>>, %arg1: memref<256x512xbf16, #tpu.memory_space<vmem>>, %arg2: memref<128x512xbf16, #tpu.memory_space<vmem>>, %arg3: memref<1x512xf32, #tpu.memory_space<vmem>>, %arg4: memref<128x64xbf16, #tpu.memory_space<vmem>>, %arg5: memref<1x64xf32, #tpu.memory_space<vmem>>, %arg6: memref<1x64xf32, #tpu.memory_space<vmem>>, %arg7: memref<1x64xf32, #tpu.memory_space<vmem>>, %arg8: memref<64x32xbf16, #tpu.memory_space<vmem>>, %arg9: memref<1x32xf32, #tpu.memory_space<vmem>>, %arg10: memref<1x32xf32, #tpu.memory_space<vmem>>, %arg11: memref<1x32xf32, #tpu.memory_space<vmem>>, %arg12: memref<32x1xbf16, #tpu.memory_space<vmem>>, %arg13: memref<1x1xf32, #tpu.memory_space<vmem>>, %arg14: memref<1x1xf32, #tpu.memory_space<vmem>>, %arg15: memref<8x512xf32, #tpu.memory_space<vmem>>) attributes {dimension_semantics = [], scalar_prefetch = 0 : i64, scratch_operands = 1 : i64, tpu.core_type = #tpu.core_type<tc>} {
    %c0 = arith.constant 0 : index
    %c0_0 = arith.constant 0 : index
    %0 = vector.load %arg0[%c0, %c0_0] : memref<8x256xf32, #tpu.memory_space<vmem>>, vector<8x256xf32>
    %1 = arith.truncf %0 : vector<8x256xf32> to vector<8x256xbf16>
    %c0_1 = arith.constant 0 : index
    %c0_2 = arith.constant 0 : index
    %2 = vector.load %arg1[%c0_1, %c0_2] : memref<256x512xbf16, #tpu.memory_space<vmem>>, vector<256x512xbf16>
    %cst = arith.constant dense<0.000000e+00> : vector<8x512xf32>
    %3 = tpu.matmul %1, %2, %cst {dimension_numbers = #tpu.dot_dimension_numbers<[1], [0], [0], [1], [0, 0, 1, 1], [], []>} : vector<8x256xbf16>, vector<256x512xbf16>, vector<8x512xf32> -> vector<8x512xf32>
    %c0_3 = arith.constant 0 : index
    %c0_4 = arith.constant 0 : index
    %4 = vector.load %arg3[%c0_3, %c0_4] : memref<1x512xf32, #tpu.memory_space<vmem>>, vector<1x512xf32>
    %5 = vector.broadcast %4 : vector<1x512xf32> to vector<8x512xf32>
    %6 = arith.addf %3, %5 : vector<8x512xf32>
    %c0_5 = arith.constant 0 : index
    %c0_6 = arith.constant 0 : index
    %7 = vector.load %arg15[%c0_5, %c0_6] : memref<8x512xf32, #tpu.memory_space<vmem>>, vector<8x512xf32>
    tpu.vector_store %arg15[%c0_5, %c0_6], %6 {strides = array<i32>} : memref<8x512xf32, #tpu.memory_space<vmem>>, vector<8x512xf32>,
    %c0_7 = arith.constant 0 : index
    %c0_8 = arith.constant 0 : index
    %8 = vector.load %arg2[%c0_7, %c0_8] : memref<128x512xbf16, #tpu.memory_space<vmem>>, vector<128x512xbf16>
    %cst_9 = arith.constant 0.000000e+00 : f32
    %9 = vector.broadcast %cst_9 : f32 to vector<1x128xf32>
    %cst_10 = arith.constant 0.000000e+00 : f32
    %10 = vector.broadcast %cst_10 : f32 to vector<1x128xf32>
    %c0_i32 = arith.constant 0 : i32
    %11 = arith.index_cast %c0_i32 : i32 to index
    %c0_11 = arith.constant 0 : index
    %12 = vector.load %arg15[%11, %c0_11] : memref<8x512xf32, #tpu.memory_space<vmem>>, vector<1x512xf32>
    %13 = arith.truncf %9 : vector<1x128xf32> to vector<1x128xbf16>
    %cst_12 = arith.constant dense<0.000000e+00> : vector<1x512xf32>
    %14 = tpu.matmul %13, %8, %cst_12 {dimension_numbers = #tpu.dot_dimension_numbers<[1], [0], [0], [1], [0, 0, 1, 1], [], []>} : vector<1x128xbf16>, vector<128x512xbf16>, vector<1x512xf32> -> vector<1x512xf32>
    %15 = arith.addf %12, %14 : vector<1x512xf32>
    %16 = vector.extract_strided_slice %15 {offsets = [0, 0], sizes = [1, 384], strides = [1, 1]} : vector<1x512xf32> to vector<1x384xf32>
    %17 = arith.negf %16 : vector<1x384xf32>
    %18 = math.exp %17 : vector<1x384xf32>
    %cst_13 = arith.constant 1.000000e+00 : f32
    %19 = vector.broadcast %cst_13 : f32 to vector<1x384xf32>
    %20 = arith.addf %19, %18 : vector<1x384xf32>
    %21 = arith.divf %19, %20 : vector<1x384xf32>
    %22 = vector.extract_strided_slice %21 {offsets = [0, 0], sizes = [1, 128], strides = [1, 1]} : vector<1x384xf32> to vector<1x128xf32>
    %23 = vector.extract_strided_slice %21 {offsets = [0, 128], sizes = [1, 128], strides = [1, 1]} : vector<1x384xf32> to vector<1x128xf32>
    %24 = vector.extract_strided_slice %21 {offsets = [0, 256], sizes = [1, 128], strides = [1, 1]} : vector<1x384xf32> to vector<1x128xf32>
    %25 = vector.extract_strided_slice %15 {offsets = [0, 384], sizes = [1, 128], strides = [1, 1]} : vector<1x512xf32> to vector<1x128xf32>
    %26 = math.tanh %25 : vector<1x128xf32>
    %27 = arith.mulf %23, %10 : vector<1x128xf32>
    %28 = arith.mulf %22, %26 : vector<1x128xf32>
    %29 = arith.addf %27, %28 : vector<1x128xf32>
    %30 = math.tanh %29 : vector<1x128xf32>
    %31 = arith.mulf %24, %30 : vector<1x128xf32>
    %c1_i32 = arith.constant 1 : i32
    %32 = arith.index_cast %c1_i32 : i32 to index
    %c0_14 = arith.constant 0 : index
    %33 = vector.load %arg15[%32, %c0_14] : memref<8x512xf32, #tpu.memory_space<vmem>>, vector<1x512xf32>
    %34 = arith.truncf %31 : vector<1x128xf32> to vector<1x128xbf16>
    %cst_15 = arith.constant dense<0.000000e+00> : vector<1x512xf32>
    %35 = tpu.matmul %34, %8, %cst_15 {dimension_numbers = #tpu.dot_dimension_numbers<[1], [0], [0], [1], [0, 0, 1, 1], [], []>} : vector<1x128xbf16>, vector<128x512xbf16>, vector<1x512xf32> -> vector<1x512xf32>
    %36 = arith.addf %33, %35 : vector<1x512xf32>
    %37 = vector.extract_strided_slice %36 {offsets = [0, 0], sizes = [1, 384], strides = [1, 1]} : vector<1x512xf32> to vector<1x384xf32>
    %38 = arith.negf %37 : vector<1x384xf32>
    %39 = math.exp %38 : vector<1x384xf32>
    %cst_16 = arith.constant 1.000000e+00 : f32
    %40 = vector.broadcast %cst_16 : f32 to vector<1x384xf32>
    %41 = arith.addf %40, %39 : vector<1x384xf32>
    %42 = arith.divf %40, %41 : vector<1x384xf32>
    %43 = vector.extract_strided_slice %42 {offsets = [0, 0], sizes = [1, 128], strides = [1, 1]} : vector<1x384xf32> to vector<1x128xf32>
    %44 = vector.extract_strided_slice %42 {offsets = [0, 128], sizes = [1, 128], strides = [1, 1]} : vector<1x384xf32> to vector<1x128xf32>
    %45 = vector.extract_strided_slice %42 {offsets = [0, 256], sizes = [1, 128], strides = [1, 1]} : vector<1x384xf32> to vector<1x128xf32>
    %46 = vector.extract_strided_slice %36 {offsets = [0, 384], sizes = [1, 128], strides = [1, 1]} : vector<1x512xf32> to vector<1x128xf32>
    %47 = math.tanh %46 : vector<1x128xf32>
    %48 = arith.mulf %44, %29 : vector<1x128xf32>
    %49 = arith.mulf %43, %47 : vector<1x128xf32>
    %50 = arith.addf %48, %49 : vector<1x128xf32>
    %51 = math.tanh %50 : vector<1x128xf32>
    %52 = arith.mulf %45, %51 : vector<1x128xf32>
    %c2_i32 = arith.constant 2 : i32
    %53 = arith.index_cast %c2_i32 : i32 to index
    %c0_17 = arith.constant 0 : index
    %54 = vector.load %arg15[%53, %c0_17] : memref<8x512xf32, #tpu.memory_space<vmem>>, vector<1x512xf32>
    %55 = arith.truncf %52 : vector<1x128xf32> to vector<1x128xbf16>
    %cst_18 = arith.constant dense<0.000000e+00> : vector<1x512xf32>
    %56 = tpu.matmul %55, %8, %cst_18 {dimension_numbers = #tpu.dot_dimension_numbers<[1], [0], [0], [1], [0, 0, 1, 1], [], []>} : vector<1x128xbf16>, vector<128x512xbf16>, vector<1x512xf32> -> vector<1x512xf32>
    %57 = arith.addf %54, %56 : vector<1x512xf32>
    %58 = vector.extract_strided_slice %57 {offsets = [0, 0], sizes = [1, 384], strides = [1, 1]} : vector<1x512xf32> to vector<1x384xf32>
    %59 = arith.negf %58 : vector<1x384xf32>
    %60 = math.exp %59 : vector<1x384xf32>
    %cst_19 = arith.constant 1.000000e+00 : f32
    %61 = vector.broadcast %cst_19 : f32 to vector<1x384xf32>
    %62 = arith.addf %61, %60 : vector<1x384xf32>
    %63 = arith.divf %61, %62 : vector<1x384xf32>
    %64 = vector.extract_strided_slice %63 {offsets = [0, 0], sizes = [1, 128], strides = [1, 1]} : vector<1x384xf32> to vector<1x128xf32>
    %65 = vector.extract_strided_slice %63 {offsets = [0, 128], sizes = [1, 128], strides = [1, 1]} : vector<1x384xf32> to vector<1x128xf32>
    %66 = vector.extract_strided_slice %63 {offsets = [0, 256], sizes = [1, 128], strides = [1, 1]} : vector<1x384xf32> to vector<1x128xf32>
    %67 = vector.extract_strided_slice %57 {offsets = [0, 384], sizes = [1, 128], strides = [1, 1]} : vector<1x512xf32> to vector<1x128xf32>
    %68 = math.tanh %67 : vector<1x128xf32>
    %69 = arith.mulf %65, %50 : vector<1x128xf32>
    %70 = arith.mulf %64, %68 : vector<1x128xf32>
    %71 = arith.addf %69, %70 : vector<1x128xf32>
    %72 = math.tanh %71 : vector<1x128xf32>
    %73 = arith.mulf %66, %72 : vector<1x128xf32>
    %c3_i32 = arith.constant 3 : i32
    %74 = arith.index_cast %c3_i32 : i32 to index
    %c0_20 = arith.constant 0 : index
    %75 = vector.load %arg15[%74, %c0_20] : memref<8x512xf32, #tpu.memory_space<vmem>>, vector<1x512xf32>
    %76 = arith.truncf %73 : vector<1x128xf32> to vector<1x128xbf16>
    %cst_21 = arith.constant dense<0.000000e+00> : vector<1x512xf32>
    %77 = tpu.matmul %76, %8, %cst_21 {dimension_numbers = #tpu.dot_dimension_numbers<[1], [0], [0], [1], [0, 0, 1, 1], [], []>} : vector<1x128xbf16>, vector<128x512xbf16>, vector<1x512xf32> -> vector<1x512xf32>
    %78 = arith.addf %75, %77 : vector<1x512xf32>
    %79 = vector.extract_strided_slice %78 {offsets = [0, 0], sizes = [1, 384], strides = [1, 1]} : vector<1x512xf32> to vector<1x384xf32>
    %80 = arith.negf %79 : vector<1x384xf32>
    %81 = math.exp %80 : vector<1x384xf32>
    %cst_22 = arith.constant 1.000000e+00 : f32
    %82 = vector.broadcast %cst_22 : f32 to vector<1x384xf32>
    %83 = arith.addf %82, %81 : vector<1x384xf32>
    %84 = arith.divf %82, %83 : vector<1x384xf32>
    %85 = vector.extract_strided_slice %84 {offsets = [0, 0], sizes = [1, 128], strides = [1, 1]} : vector<1x384xf32> to vector<1x128xf32>
    %86 = vector.extract_strided_slice %84 {offsets = [0, 128], sizes = [1, 128], strides = [1, 1]} : vector<1x384xf32> to vector<1x128xf32>
    %87 = vector.extract_strided_slice %84 {offsets = [0, 256], sizes = [1, 128], strides = [1, 1]} : vector<1x384xf32> to vector<1x128xf32>
    %88 = vector.extract_strided_slice %78 {offsets = [0, 384], sizes = [1, 128], strides = [1, 1]} : vector<1x512xf32> to vector<1x128xf32>
    %89 = math.tanh %88 : vector<1x128xf32>
    %90 = arith.mulf %86, %71 : vector<1x128xf32>
    %91 = arith.mulf %85, %89 : vector<1x128xf32>
    %92 = arith.addf %90, %91 : vector<1x128xf32>
    %93 = math.tanh %92 : vector<1x128xf32>
    %94 = arith.mulf %87, %93 : vector<1x128xf32>
    %c4_i32 = arith.constant 4 : i32
    %95 = arith.index_cast %c4_i32 : i32 to index
    %c0_23 = arith.constant 0 : index
    %96 = vector.load %arg15[%95, %c0_23] : memref<8x512xf32, #tpu.memory_space<vmem>>, vector<1x512xf32>
    %97 = arith.truncf %94 : vector<1x128xf32> to vector<1x128xbf16>
    %cst_24 = arith.constant dense<0.000000e+00> : vector<1x512xf32>
    %98 = tpu.matmul %97, %8, %cst_24 {dimension_numbers = #tpu.dot_dimension_numbers<[1], [0], [0], [1], [0, 0, 1, 1], [], []>} : vector<1x128xbf16>, vector<128x512xbf16>, vector<1x512xf32> -> vector<1x512xf32>
    %99 = arith.addf %96, %98 : vector<1x512xf32>
    %100 = vector.extract_strided_slice %99 {offsets = [0, 0], sizes = [1, 384], strides = [1, 1]} : vector<1x512xf32> to vector<1x384xf32>
    %101 = arith.negf %100 : vector<1x384xf32>
    %102 = math.exp %101 : vector<1x384xf32>
    %cst_25 = arith.constant 1.000000e+00 : f32
    %103 = vector.broadcast %cst_25 : f32 to vector<1x384xf32>
    %104 = arith.addf %103, %102 : vector<1x384xf32>
    %105 = arith.divf %103, %104 : vector<1x384xf32>
    %106 = vector.extract_strided_slice %105 {offsets = [0, 0], sizes = [1, 128], strides = [1, 1]} : vector<1x384xf32> to vector<1x128xf32>
    %107 = vector.extract_strided_slice %105 {offsets = [0, 128], sizes = [1, 128], strides = [1, 1]} : vector<1x384xf32> to vector<1x128xf32>
    %108 = vector.extract_strided_slice %105 {offsets = [0, 256], sizes = [1, 128], strides = [1, 1]} : vector<1x384xf32> to vector<1x128xf32>
    %109 = vector.extract_strided_slice %99 {offsets = [0, 384], sizes = [1, 128], strides = [1, 1]} : vector<1x512xf32> to vector<1x128xf32>
    %110 = math.tanh %109 : vector<1x128xf32>
    %111 = arith.mulf %107, %92 : vector<1x128xf32>
    %112 = arith.mulf %106, %110 : vector<1x128xf32>
    %113 = arith.addf %111, %112 : vector<1x128xf32>
    %114 = math.tanh %113 : vector<1x128xf32>
    %115 = arith.mulf %108, %114 : vector<1x128xf32>
    %c5_i32 = arith.constant 5 : i32
    %116 = arith.index_cast %c5_i32 : i32 to index
    %c0_26 = arith.constant 0 : index
    %117 = vector.load %arg15[%116, %c0_26] : memref<8x512xf32, #tpu.memory_space<vmem>>, vector<1x512xf32>
    %118 = arith.truncf %115 : vector<1x128xf32> to vector<1x128xbf16>
    %cst_27 = arith.constant dense<0.000000e+00> : vector<1x512xf32>
    %119 = tpu.matmul %118, %8, %cst_27 {dimension_numbers = #tpu.dot_dimension_numbers<[1], [0], [0], [1], [0, 0, 1, 1], [], []>} : vector<1x128xbf16>, vector<128x512xbf16>, vector<1x512xf32> -> vector<1x512xf32>
    %120 = arith.addf %117, %119 : vector<1x512xf32>
    %121 = vector.extract_strided_slice %120 {offsets = [0, 0], sizes = [1, 384], strides = [1, 1]} : vector<1x512xf32> to vector<1x384xf32>
    %122 = arith.negf %121 : vector<1x384xf32>
    %123 = math.exp %122 : vector<1x384xf32>
    %cst_28 = arith.constant 1.000000e+00 : f32
    %124 = vector.broadcast %cst_28 : f32 to vector<1x384xf32>
    %125 = arith.addf %124, %123 : vector<1x384xf32>
    %126 = arith.divf %124, %125 : vector<1x384xf32>
    %127 = vector.extract_strided_slice %126 {offsets = [0, 0], sizes = [1, 128], strides = [1, 1]} : vector<1x384xf32> to vector<1x128xf32>
    %128 = vector.extract_strided_slice %126 {offsets = [0, 128], sizes = [1, 128], strides = [1, 1]} : vector<1x384xf32> to vector<1x128xf32>
    %129 = vector.extract_strided_slice %126 {offsets = [0, 256], sizes = [1, 128], strides = [1, 1]} : vector<1x384xf32> to vector<1x128xf32>
    %130 = vector.extract_strided_slice %120 {offsets = [0, 384], sizes = [1, 128], strides = [1, 1]} : vector<1x512xf32> to vector<1x128xf32>
    %131 = math.tanh %130 : vector<1x128xf32>
    %132 = arith.mulf %128, %113 : vector<1x128xf32>
    %133 = arith.mulf %127, %131 : vector<1x128xf32>
    %134 = arith.addf %132, %133 : vector<1x128xf32>
    %135 = math.tanh %134 : vector<1x128xf32>
    %136 = arith.mulf %129, %135 : vector<1x128xf32>
    %c6_i32 = arith.constant 6 : i32
    %137 = arith.index_cast %c6_i32 : i32 to index
    %c0_29 = arith.constant 0 : index
    %138 = vector.load %arg15[%137, %c0_29] : memref<8x512xf32, #tpu.memory_space<vmem>>, vector<1x512xf32>
    %139 = arith.truncf %136 : vector<1x128xf32> to vector<1x128xbf16>
    %cst_30 = arith.constant dense<0.000000e+00> : vector<1x512xf32>
    %140 = tpu.matmul %139, %8, %cst_30 {dimension_numbers = #tpu.dot_dimension_numbers<[1], [0], [0], [1], [0, 0, 1, 1], [], []>} : vector<1x128xbf16>, vector<128x512xbf16>, vector<1x512xf32> -> vector<1x512xf32>
    %141 = arith.addf %138, %140 : vector<1x512xf32>
    %142 = vector.extract_strided_slice %141 {offsets = [0, 0], sizes = [1, 384], strides = [1, 1]} : vector<1x512xf32> to vector<1x384xf32>
    %143 = arith.negf %142 : vector<1x384xf32>
    %144 = math.exp %143 : vector<1x384xf32>
    %cst_31 = arith.constant 1.000000e+00 : f32
    %145 = vector.broadcast %cst_31 : f32 to vector<1x384xf32>
    %146 = arith.addf %145, %144 : vector<1x384xf32>
    %147 = arith.divf %145, %146 : vector<1x384xf32>
    %148 = vector.extract_strided_slice %147 {offsets = [0, 0], sizes = [1, 128], strides = [1, 1]} : vector<1x384xf32> to vector<1x128xf32>
    %149 = vector.extract_strided_slice %147 {offsets = [0, 128], sizes = [1, 128], strides = [1, 1]} : vector<1x384xf32> to vector<1x128xf32>
    %150 = vector.extract_strided_slice %147 {offsets = [0, 256], sizes = [1, 128], strides = [1, 1]} : vector<1x384xf32> to vector<1x128xf32>
    %151 = vector.extract_strided_slice %141 {offsets = [0, 384], sizes = [1, 128], strides = [1, 1]} : vector<1x512xf32> to vector<1x128xf32>
    %152 = math.tanh %151 : vector<1x128xf32>
    %153 = arith.mulf %149, %134 : vector<1x128xf32>
    %154 = arith.mulf %148, %152 : vector<1x128xf32>
    %155 = arith.addf %153, %154 : vector<1x128xf32>
    %156 = math.tanh %155 : vector<1x128xf32>
    %157 = arith.mulf %150, %156 : vector<1x128xf32>
    %c7_i32 = arith.constant 7 : i32
    %158 = arith.index_cast %c7_i32 : i32 to index
    %c0_32 = arith.constant 0 : index
    %159 = vector.load %arg15[%158, %c0_32] : memref<8x512xf32, #tpu.memory_space<vmem>>, vector<1x512xf32>
    %160 = arith.truncf %157 : vector<1x128xf32> to vector<1x128xbf16>
    %cst_33 = arith.constant dense<0.000000e+00> : vector<1x512xf32>
    %161 = tpu.matmul %160, %8, %cst_33 {dimension_numbers = #tpu.dot_dimension_numbers<[1], [0], [0], [1], [0, 0, 1, 1], [], []>} : vector<1x128xbf16>, vector<128x512xbf16>, vector<1x512xf32> -> vector<1x512xf32>
    %162 = arith.addf %159, %161 : vector<1x512xf32>
    %163 = vector.extract_strided_slice %162 {offsets = [0, 0], sizes = [1, 384], strides = [1, 1]} : vector<1x512xf32> to vector<1x384xf32>
    %164 = arith.negf %163 : vector<1x384xf32>
    %165 = math.exp %164 : vector<1x384xf32>
    %cst_34 = arith.constant 1.000000e+00 : f32
    %166 = vector.broadcast %cst_34 : f32 to vector<1x384xf32>
    %167 = arith.addf %166, %165 : vector<1x384xf32>
    %168 = arith.divf %166, %167 : vector<1x384xf32>
    %169 = vector.extract_strided_slice %168 {offsets = [0, 0], sizes = [1, 128], strides = [1, 1]} : vector<1x384xf32> to vector<1x128xf32>
    %170 = vector.extract_strided_slice %168 {offsets = [0, 128], sizes = [1, 128], strides = [1, 1]} : vector<1x384xf32> to vector<1x128xf32>
    %171 = vector.extract_strided_slice %168 {offsets = [0, 256], sizes = [1, 128], strides = [1, 1]} : vector<1x384xf32> to vector<1x128xf32>
    %172 = vector.extract_strided_slice %162 {offsets = [0, 384], sizes = [1, 128], strides = [1, 1]} : vector<1x512xf32> to vector<1x128xf32>
    %173 = math.tanh %172 : vector<1x128xf32>
    %174 = arith.mulf %170, %155 : vector<1x128xf32>
    %175 = arith.mulf %169, %173 : vector<1x128xf32>
    %176 = arith.addf %174, %175 : vector<1x128xf32>
    %177 = math.tanh %176 : vector<1x128xf32>
    %178 = arith.mulf %171, %177 : vector<1x128xf32>
    %c8_i32 = arith.constant 8 : i32
    %179 = arith.truncf %178 : vector<1x128xf32> to vector<1x128xbf16>
    %c0_35 = arith.constant 0 : index
    %c0_36 = arith.constant 0 : index
    %180 = vector.load %arg4[%c0_35, %c0_36] : memref<128x64xbf16, #tpu.memory_space<vmem>>, vector<128x64xbf16>
    %cst_37 = arith.constant dense<0.000000e+00> : vector<1x64xf32>
    %181 = tpu.matmul %179, %180, %cst_37 {dimension_numbers = #tpu.dot_dimension_numbers<[1], [0], [0], [1], [0, 0, 1, 1], [], []>} : vector<1x128xbf16>, vector<128x64xbf16>, vector<1x64xf32> -> vector<1x64xf32>
    %c0_38 = arith.constant 0 : index
    %c0_39 = arith.constant 0 : index
    %182 = vector.load %arg5[%c0_38, %c0_39] : memref<1x64xf32, #tpu.memory_space<vmem>>, vector<1x64xf32>
    %183 = arith.addf %181, %182 : vector<1x64xf32>
    %c0_40 = arith.constant 0 : index
    %c0_41 = arith.constant 0 : index
    %184 = vector.load %arg6[%c0_40, %c0_41] : memref<1x64xf32, #tpu.memory_space<vmem>>, vector<1x64xf32>
    %c0_42 = arith.constant 0 : index
    %c0_43 = arith.constant 0 : index
    %185 = vector.load %arg7[%c0_42, %c0_43] : memref<1x64xf32, #tpu.memory_space<vmem>>, vector<1x64xf32>
    %cst_44 = arith.constant dense<0.000000e+00> : vector<1xf32>
    %186 = vector.multi_reduction <add>, %183, %cst_44 [1] : vector<1x64xf32> to vector<1xf32>
    %187 = vector.shape_cast %186 : vector<1xf32> to vector<1x1xf32>
    %cst_45 = arith.constant 6.400000e+01 : f32
    %188 = vector.broadcast %cst_45 : f32 to vector<1x1xf32>
    %189 = arith.divf %187, %188 : vector<1x1xf32>
    %190 = vector.broadcast %189 : vector<1x1xf32> to vector<1x64xf32>
    %191 = arith.subf %183, %190 : vector<1x64xf32>
    %192 = arith.mulf %191, %191 : vector<1x64xf32>
    %cst_46 = arith.constant dense<0.000000e+00> : vector<1xf32>
    %193 = vector.multi_reduction <add>, %192, %cst_46 [1] : vector<1x64xf32> to vector<1xf32>
    %194 = vector.shape_cast %193 : vector<1xf32> to vector<1x1xf32>
    %cst_47 = arith.constant 6.400000e+01 : f32
    %195 = vector.broadcast %cst_47 : f32 to vector<1x1xf32>
    %196 = arith.divf %194, %195 : vector<1x1xf32>
    %197 = vector.broadcast %189 : vector<1x1xf32> to vector<1x64xf32>
    %198 = arith.subf %183, %197 : vector<1x64xf32>
    %cst_48 = arith.constant 9.99999974E-6 : f32
    %199 = vector.broadcast %cst_48 : f32 to vector<1x1xf32>
    %200 = arith.addf %196, %199 : vector<1x1xf32>
    %201 = math.rsqrt %200 : vector<1x1xf32>
    %202 = vector.broadcast %201 : vector<1x1xf32> to vector<1x64xf32>
    %203 = arith.mulf %198, %202 : vector<1x64xf32>
    %204 = arith.mulf %203, %184 : vector<1x64xf32>
    %205 = arith.addf %204, %185 : vector<1x64xf32>
    %cst_49 = arith.constant 0.000000e+00 : f32
    %206 = vector.broadcast %cst_49 : f32 to vector<1x64xf32>
    %207 = arith.cmpf ogt, %205, %206 : vector<1x64xf32>
    %cst_50 = arith.constant 0.00999999977 : f32
    %208 = vector.broadcast %cst_50 : f32 to vector<1x64xf32>
    %209 = arith.mulf %208, %205 : vector<1x64xf32>
    %210 = arith.select %207, %205, %209 : vector<1x64xi1>, vector<1x64xf32>
    %211 = arith.truncf %210 : vector<1x64xf32> to vector<1x64xbf16>
    %c0_51 = arith.constant 0 : index
    %c0_52 = arith.constant 0 : index
    %212 = vector.load %arg8[%c0_51, %c0_52] : memref<64x32xbf16, #tpu.memory_space<vmem>>, vector<64x32xbf16>
    %cst_53 = arith.constant dense<0.000000e+00> : vector<1x32xf32>
    %213 = tpu.matmul %211, %212, %cst_53 {dimension_numbers = #tpu.dot_dimension_numbers<[1], [0], [0], [1], [0, 0, 1, 1], [], []>} : vector<1x64xbf16>, vector<64x32xbf16>, vector<1x32xf32> -> vector<1x32xf32>
    %c0_54 = arith.constant 0 : index
    %c0_55 = arith.constant 0 : index
    %214 = vector.load %arg9[%c0_54, %c0_55] : memref<1x32xf32, #tpu.memory_space<vmem>>, vector<1x32xf32>
    %215 = arith.addf %213, %214 : vector<1x32xf32>
    %c0_56 = arith.constant 0 : index
    %c0_57 = arith.constant 0 : index
    %216 = vector.load %arg10[%c0_56, %c0_57] : memref<1x32xf32, #tpu.memory_space<vmem>>, vector<1x32xf32>
    %c0_58 = arith.constant 0 : index
    %c0_59 = arith.constant 0 : index
    %217 = vector.load %arg11[%c0_58, %c0_59] : memref<1x32xf32, #tpu.memory_space<vmem>>, vector<1x32xf32>
    %cst_60 = arith.constant dense<0.000000e+00> : vector<1xf32>
    %218 = vector.multi_reduction <add>, %215, %cst_60 [1] : vector<1x32xf32> to vector<1xf32>
    %219 = vector.shape_cast %218 : vector<1xf32> to vector<1x1xf32>
    %cst_61 = arith.constant 3.200000e+01 : f32
    %220 = vector.broadcast %cst_61 : f32 to vector<1x1xf32>
    %221 = arith.divf %219, %220 : vector<1x1xf32>
    %222 = vector.broadcast %221 : vector<1x1xf32> to vector<1x32xf32>
    %223 = arith.subf %215, %222 : vector<1x32xf32>
    %224 = arith.mulf %223, %223 : vector<1x32xf32>
    %cst_62 = arith.constant dense<0.000000e+00> : vector<1xf32>
    %225 = vector.multi_reduction <add>, %224, %cst_62 [1] : vector<1x32xf32> to vector<1xf32>
    %226 = vector.shape_cast %225 : vector<1xf32> to vector<1x1xf32>
    %cst_63 = arith.constant 3.200000e+01 : f32
    %227 = vector.broadcast %cst_63 : f32 to vector<1x1xf32>
    %228 = arith.divf %226, %227 : vector<1x1xf32>
    %229 = vector.broadcast %221 : vector<1x1xf32> to vector<1x32xf32>
    %230 = arith.subf %215, %229 : vector<1x32xf32>
    %cst_64 = arith.constant 9.99999974E-6 : f32
    %231 = vector.broadcast %cst_64 : f32 to vector<1x1xf32>
    %232 = arith.addf %228, %231 : vector<1x1xf32>
    %233 = math.rsqrt %232 : vector<1x1xf32>
    %234 = vector.broadcast %233 : vector<1x1xf32> to vector<1x32xf32>
    %235 = arith.mulf %230, %234 : vector<1x32xf32>
    %236 = arith.mulf %235, %216 : vector<1x32xf32>
    %237 = arith.addf %236, %217 : vector<1x32xf32>
    %cst_65 = arith.constant 0.000000e+00 : f32
    %238 = vector.broadcast %cst_65 : f32 to vector<1x32xf32>
    %239 = arith.cmpf ogt, %237, %238 : vector<1x32xf32>
    %cst_66 = arith.constant 0.00999999977 : f32
    %240 = vector.broadcast %cst_66 : f32 to vector<1x32xf32>
    %241 = arith.mulf %240, %237 : vector<1x32xf32>
    %242 = arith.select %239, %237, %241 : vector<1x32xi1>, vector<1x32xf32>
    %243 = arith.truncf %242 : vector<1x32xf32> to vector<1x32xbf16>
    %c0_67 = arith.constant 0 : index
    %c0_68 = arith.constant 0 : index
    %244 = vector.load %arg12[%c0_67, %c0_68] : memref<32x1xbf16, #tpu.memory_space<vmem>>, vector<32x1xbf16>
    %cst_69 = arith.constant dense<0.000000e+00> : vector<1x1xf32>
    %245 = tpu.matmul %243, %244, %cst_69 {dimension_numbers = #tpu.dot_dimension_numbers<[1], [0], [0], [1], [0, 0, 1, 1], [], []>} : vector<1x32xbf16>, vector<32x1xbf16>, vector<1x1xf32> -> vector<1x1xf32>
    %c0_70 = arith.constant 0 : index
    %c0_71 = arith.constant 0 : index
    %246 = vector.load %arg13[%c0_70, %c0_71] : memref<1x1xf32, #tpu.memory_space<vmem>>, vector<1x1xf32>
    %247 = arith.addf %245, %246 : vector<1x1xf32>
    %248 = math.tanh %247 : vector<1x1xf32>
    %c0_72 = arith.constant 0 : index
    %c0_73 = arith.constant 0 : index
    %249 = vector.load %arg14[%c0_72, %c0_73] : memref<1x1xf32, #tpu.memory_space<vmem>>, vector<1x1xf32>
    tpu.vector_store %arg14[%c0_72, %c0_73], %248 {strides = array<i32>} : memref<1x1xf32, #tpu.memory_space<vmem>>, vector<1x1xf32>,
    return
  }
}

</mosaic_0001>

<bundles_post_ra>
// kernel: tpu_custom_call.1
= control target key start
LH: loop header
LB: loop body
LE: loop exit
PB: predicated region body
PF: predicated region fallthrough
CT: control target
= control target key end

     0   :  { %s3211_s0 = inlined_call_operand.vmem [shape: f32[8,256], index: 0, kind: input, shape index: {}]   ;;  %s3212_s1 = inlined_call_operand.hbm [shape: bf16[256,512], index: 1, kind: input, shape index: {}]   ;;  %s3213_s2 = inlined_call_operand.hbm [shape: bf16[128,512], index: 2, kind: input, shape index: {}]   ;;  %s3214_s3 = inlined_call_operand.vmem [shape: f32[1,512], index: 3, kind: input, shape index: {}]   ;;  %s3215_s4 = inlined_call_operand.vmem [shape: bf16[128,64], index: 4, kind: input, shape index: {}]   ;;  %s3216_s5 = inlined_call_operand.vmem [shape: f32[1,64], index: 5, kind: input, shape index: {}]   ;;  %s3217_s6 = inlined_call_operand.vmem [shape: f32[1,64], index: 6, kind: input, shape index: {}]   ;;  %s3218_s7 = inlined_call_operand.vmem [shape: f32[1,64], index: 7, kind: input, shape index: {}]   ;;  %s3219_s8 = inlined_call_operand.vmem [shape: bf16[64,32], index: 8, kind: input, shape index: {}]   ;;  %s3220_s9 = inlined_call_operand.vmem [shape: f32[1,32], index: 9, kind: input, shape index: {}]   ;;  %s3221_s10 = inlined_call_operand.vmem [shape: f32[1,32], index: 10, kind: input, shape index: {}]   ;;  %s3222_s11 = inlined_call_operand.vmem [shape: f32[1,32], index: 11, kind: input, shape index: {}]   ;;  %s3223_s12 = inlined_call_operand.vmem [shape: bf16[32,1], index: 12, kind: input, shape index: {}]   ;;  %s3224_s13 = inlined_call_operand.<no memory space> [shape: f32[1,1], index: 13, kind: input, shape index: {}]   ;;  %s3225_s14 = inlined_call_operand.hbm [shape: f32[1,1], index: 14, kind: output, shape index: {}]  }
   0x1   :  { %v19_v0 = vstv %s3224_s13 }
   0x2   :  { %20 = vst [vmem:[#allocation3] sm:$0x1] %v19_v0 }
   0x3   :  { %21 = vsyncpa [#allocation5], 0 }
   0x4   :  { %22 = vsyncpa [#allocation8], 0 }
   0x5   :  { %23 = vsyncpa [#allocation6], 0  ;;  %s2648_s15 = smov [#allocation4]  }
   0x6   :  { %s31_s16 = sshll.u32 %s2648_s15, 4  ;;  %s32_s16 = int_to_ptr.vmem [resolvable:$true] %s31_s16 }
   0x7   :  { %s2590_s17 = scalar_lea.vmem %s32_s16, 8192  ;;  %p2595_p1 = scmp.lt.s32.totalorder %s32_s16, %s32_s16 }
   0x8   :  { %p2591_p0 = scmp.ne.s32.totalorder %s32_s16, %s2590_s17  ;;  %p2596_p2 = scmp.lt.s32.totalorder %s2590_s17, %s2590_s17 }
   0xa   :  { %p2597_p3 = por %p2596_p2, %p2595_p1 }
   0xc   :  { %p2598_p4 = pnand %p2597_p3, %p2591_p0 }
   0xe   :  { %2601 = shalt.err (!%p2598_p4)
}
   0xf   :  { %s2649_s18 = smov 256   ;;  %s2650_s19 = smov 16  }
  0x10   :  { %37 = dma.hbm_to_vmem [thread:$0]  %s3212_s1, 8192, %s32_s16, [#allocation5], %s2649_s18, %s2649_s18, %s2650_s19  }
  0x11   :  { %s2651_s13 = smov [#allocation7]  }
  0x12   :  { %s43_s22 = sshll.u32 %s2651_s13, 4  ;;  %s44_s22 = int_to_ptr.vmem [resolvable:$true] %s43_s22 }
  0x13   :  { %s2610_s23 = scalar_lea.vmem %s44_s22, 4096  ;;  %p2615_p6 = scmp.lt.s32.totalorder %s44_s22, %s44_s22 }
  0x14   :  { %p2611_p5 = scmp.ne.s32.totalorder %s44_s22, %s2610_s23  ;;  %p2616_p7 = scmp.lt.s32.totalorder %s2610_s23, %s2610_s23 }
  0x16   :  { %p2617_p8 = por %p2616_p7, %p2615_p6 }
  0x18   :  { %p2618_p9 = pnand %p2617_p8, %p2611_p5 }
  0x1a   :  { %2621 = shalt.err (!%p2618_p9)
}
  0x1b   :  { %49 = dma.hbm_to_vmem [thread:$0]  %s3213_s2, 4096, %s44_s22, [#allocation8], %s2649_s18, %s2649_s18, %s2650_s19  }
  0x1c   :  { %2642 = dma.done.wait [#allocation5], 8192  }
  0x1d   :  { %2643 = vsyncadd [#allocation5], 4294959104 }
  0x1e   :  { %2644 = dma.done.wait [#allocation8], 4096  }
  0x1f   :  { %2645 = vsyncadd [#allocation8], 4294963200  ;;  %v2340_v1 = vld [vmem:[#allocation4 + $0xe4] ss:$16 sps:$4 sm:$0xff]   ;;  %v2342_v2 = vld [vmem:[#allocation4 + $0xec] ss:$16 sps:$4 sm:$0xff]  }
  0x20   :  { %489 = vmatprep.subr.bf16.mxu0 %v2340_v1  ;;  %v2344_v3 = vld [vmem:[#allocation4 + $0xe0] ss:$16 sps:$4 sm:$0xff]   ;;  %v2345_v4 = vld [vmem:[#allocation4 + $0xe8] ss:$16 sps:$4 sm:$0xff]   ;;  %530 = vmatprep.subr.bf16.mxu1 %v2342_v2  ;;  %v2346_v5 = vld [vmem:[#allocation4 + $0xc4] ss:$16 sps:$4 sm:$0xff]  }
  0x21   :  { %490 = vmatpush1.bf16.msra.mxu0 %v2344_v3  ;;  %531 = vmatpush1.bf16.msra.mxu1 %v2345_v4  ;;  %v2348_v6 = vld [vmem:[#allocation4 + $0xcc] ss:$16 sps:$4 sm:$0xff]   ;;  %v2350_v7 = vld [vmem:[#allocation4 + $0xc0] ss:$16 sps:$4 sm:$0xff]   ;;  %v2351_v8 = vld [vmem:[#allocation4 + $0xc8] ss:$16 sps:$4 sm:$0xff]  }
  0x22   :  { %491 = vmatprep.subr.bf16.mxu0 %v2346_v5  ;;  %532 = vmatprep.subr.bf16.mxu1 %v2348_v6  ;;  %v2352_v9 = vld [vmem:[#allocation4 + $0xa4] ss:$16 sps:$4 sm:$0xff]   ;;  %v2354_v10 = vld [vmem:[#allocation4 + $0xac] ss:$16 sps:$4 sm:$0xff]   ;;  %v2356_v11 = vld [vmem:[#allocation4 + $0xa0] ss:$16 sps:$4 sm:$0xff]  }
  0x23   :  { %v2357_v12 = vld [vmem:[#allocation4 + $0xa8] ss:$16 sps:$4 sm:$0xff]   ;;  %v2358_v13 = vld [vmem:[#allocation4 + $0x84] ss:$16 sps:$4 sm:$0xff]   ;;  %v2360_v14 = vld [vmem:[#allocation4 + $0x8c] ss:$16 sps:$4 sm:$0xff]  }
  0x24   :  { %v2362_v15 = vld [vmem:[#allocation4 + $0x80] ss:$16 sps:$4 sm:$0xff]   ;;  %v2363_v16 = vld [vmem:[#allocation4 + $0x88] ss:$16 sps:$4 sm:$0xff]   ;;  %v2364_v17 = vld [vmem:[#allocation4 + $0x64] ss:$16 sps:$4 sm:$0xff]  }
  0x25   :  { %492 = vmatpush1.bf16.msra.mxu0 %v2350_v7  ;;  %533 = vmatpush1.bf16.msra.mxu1 %v2351_v8  ;;  %v2366_v18 = vld [vmem:[#allocation4 + $0x6c] ss:$16 sps:$4 sm:$0xff]   ;;  %v2368_v19 = vld [vmem:[#allocation4 + $0x60] ss:$16 sps:$4 sm:$0xff]   ;;  %v2369_v20 = vld [vmem:[#allocation4 + $0x68] ss:$16 sps:$4 sm:$0xff]  }
  0x26   :  { %493 = vmatprep.subr.bf16.mxu0 %v2352_v9  ;;  %534 = vmatprep.subr.bf16.mxu1 %v2354_v10  ;;  %v2370_v21 = vld [vmem:[#allocation4 + $0x44] ss:$16 sps:$4 sm:$0xff]   ;;  %v2372_v22 = vld [vmem:[#allocation4 + $0x4c] ss:$16 sps:$4 sm:$0xff]   ;;  %v2374_v23 = vld [vmem:[#allocation4 + $0x40] ss:$16 sps:$4 sm:$0xff]  }
  0x27   :  { %v2375_v24 = vld [vmem:[#allocation4 + $0x48] ss:$16 sps:$4 sm:$0xff]   ;;  %v2376_v25 = vld [vmem:[#allocation4 + $0x24] ss:$16 sps:$4 sm:$0xff]   ;;  %v2378_v26 = vld [vmem:[#allocation4 + $0x2c] ss:$16 sps:$4 sm:$0xff]  }
  0x28   :  { %v2380_v27 = vld [vmem:[#allocation4 + $0x20] ss:$16 sps:$4 sm:$0xff]   ;;  %v2381_v28 = vld [vmem:[#allocation4 + $0x28] ss:$16 sps:$4 sm:$0xff]   ;;  %v2382_v29 = vld [vmem:[#allocation4 + $0x4] ss:$16 sps:$4 sm:$0xff]  }
  0x29   :  { %494 = vmatpush1.bf16.msra.mxu0 %v2356_v11  ;;  %535 = vmatpush1.bf16.msra.mxu1 %v2357_v12  ;;  %v2384_v30 = vld [vmem:[#allocation4 + $0xc] ss:$16 sps:$4 sm:$0xff]   ;;  %v2386_v31 = vld [vmem:[#allocation4] ss:$16 sps:$4 sm:$0xff]   ;;  %v2387_v32 = vld [vmem:[#allocation4 + $0x8] ss:$16 sps:$4 sm:$0xff]  }
  0x2a   :  { %495 = vmatprep.subr.bf16.mxu0 %v2358_v13  ;;  %536 = vmatprep.subr.bf16.mxu1 %v2360_v14  ;;  %v2388_v33 = vld [vmem:[#allocation4 + $0x1e4] ss:$16 sps:$4 sm:$0xff]   ;;  %v2390_v34 = vld [vmem:[#allocation4 + $0x1ec] ss:$16 sps:$4 sm:$0xff]   ;;  %v2392_v35 = vld [vmem:[#allocation4 + $0x1e0] ss:$16 sps:$4 sm:$0xff]  }
  0x2b   :  { %v2393_v36 = vld [vmem:[#allocation4 + $0x1e8] ss:$16 sps:$4 sm:$0xff]   ;;  %v2394_v37 = vld [vmem:[#allocation4 + $0x1c4] ss:$16 sps:$4 sm:$0xff]   ;;  %v2396_v38 = vld [vmem:[#allocation4 + $0x1cc] ss:$16 sps:$4 sm:$0xff]  }
  0x2c   :  { %v2398_v39 = vld [vmem:[#allocation4 + $0x1c0] ss:$16 sps:$4 sm:$0xff]   ;;  %v2399_v40 = vld [vmem:[#allocation4 + $0x1c8] ss:$16 sps:$4 sm:$0xff]   ;;  %v2400_v41 = vld [vmem:[#allocation4 + $0x1a4] ss:$16 sps:$4 sm:$0xff]  }
  0x2d   :  { %496 = vmatpush1.bf16.msra.mxu0 %v2362_v15  ;;  %537 = vmatpush1.bf16.msra.mxu1 %v2363_v16  ;;  %v2402_v42 = vld [vmem:[#allocation4 + $0x1ac] ss:$16 sps:$4 sm:$0xff]   ;;  %v2404_v43 = vld [vmem:[#allocation4 + $0x1a0] ss:$16 sps:$4 sm:$0xff]   ;;  %v2405_v44 = vld [vmem:[#allocation4 + $0x1a8] ss:$16 sps:$4 sm:$0xff]  }
  0x2e   :  { %497 = vmatprep.subr.bf16.mxu0 %v2364_v17  ;;  %538 = vmatprep.subr.bf16.mxu1 %v2366_v18  ;;  %v2406_v45 = vld [vmem:[#allocation4 + $0x184] ss:$16 sps:$4 sm:$0xff]   ;;  %v2408_v46 = vld [vmem:[#allocation4 + $0x18c] ss:$16 sps:$4 sm:$0xff]   ;;  %v2410_v48 = vld [vmem:[#allocation4 + $0x180] ss:$16 sps:$4 sm:$0xff]  }
  0x2f   :  { %v80_v47 = vld [vmem:[%s3211_s0 + $0x8] sm:$0xff]  ;;  %v2416_v53 = vld [vmem:[#allocation4 + $0x160] ss:$16 sps:$4 sm:$0xff]   ;;  %v2652_v17 = vmov 0   ;;  %vm2655_vm0 = vmmov 0   ;;  %vm1953_vm1 = vcmask 516096  }
  0x30   :  { %v82_v49 = vpack.c.bf16 %v80_v47, %v80_v47  ;;  %v2411_v50 = vld [vmem:[#allocation4 + $0x188] ss:$16 sps:$4 sm:$0xff]   ;;  %v2412_v51 = vld [vmem:[#allocation4 + $0x164] ss:$16 sps:$4 sm:$0xff]   ;;  %v2414_v52 = vld [vmem:[#allocation4 + $0x16c] ss:$16 sps:$4 sm:$0xff]  }
  0x31   :  { %498 = vmatpush1.bf16.msra.mxu0 %v2368_v19  ;;  %539 = vmatpush1.bf16.msra.mxu1 %v2369_v20  ;;  %v2417_v54 = vld [vmem:[#allocation4 + $0x168] ss:$16 sps:$4 sm:$0xff]   ;;  %v2418_v55 = vld [vmem:[#allocation4 + $0x144] ss:$16 sps:$4 sm:$0xff]   ;;  %v2420_v56 = vld [vmem:[#allocation4 + $0x14c] ss:$16 sps:$4 sm:$0xff]  }
  0x32   :  { %499 = vmatprep.subr.bf16.mxu0 %v2370_v21  ;;  %540 = vmatprep.subr.bf16.mxu1 %v2372_v22  ;;  %v2422_v57 = vld [vmem:[#allocation4 + $0x140] ss:$16 sps:$4 sm:$0xff]   ;;  %v2423_v58 = vld [vmem:[#allocation4 + $0x148] ss:$16 sps:$4 sm:$0xff]   ;;  %v2424_v59 = vld [vmem:[#allocation4 + $0x124] ss:$16 sps:$4 sm:$0xff]  }
  0x33   :  { %521 = vmatprep.mubr.bf16.mxu0 %v82_v49  ;;  %562 = vmatprep.mubr.bf16.mxu1 %v82_v49  ;;  %v2426_v60 = vld [vmem:[#allocation4 + $0x12c] ss:$16 sps:$4 sm:$0xff]   ;;  %v2428_v61 = vld [vmem:[#allocation4 + $0x120] ss:$16 sps:$4 sm:$0xff]   ;;  %v2429_v62 = vld [vmem:[#allocation4 + $0x128] ss:$16 sps:$4 sm:$0xff]  }
  0x34   :  { %v2430_v63 = vld [vmem:[#allocation4 + $0x104] ss:$16 sps:$4 sm:$0xff]   ;;  %v2432_v0 = vld [vmem:[#allocation4 + $0x10c] ss:$16 sps:$4 sm:$0xff]   ;;  %v2434_v1 = vld [vmem:[#allocation4 + $0x100] ss:$16 sps:$4 sm:$0xff]  }
  0x35   :  { %500 = vmatpush1.bf16.msra.mxu0 %v2374_v23  ;;  %541 = vmatpush1.bf16.msra.mxu1 %v2375_v24  ;;  %v2435_v2 = vld [vmem:[#allocation4 + $0x108] ss:$16 sps:$4 sm:$0xff]   ;;  %v79_v3 = vld [vmem:[%s3211_s0] sm:$0xff]  ;;  %vm2007_vm3 = vcmask 523264   ;;  %vm2053_vm4 = vcmask 253952   ;;  %vm2091_vm6 = vcmask 261120  }
  0x36   :  { %501 = vmatprep.subr.bf16.mxu0 %v2376_v25  ;;  %542 = vmatprep.subr.bf16.mxu1 %v2378_v26  ;;  %v2747_v4 = vld [vmem:[#allocation7 + $0xe4] ss:$16 sps:$4 sm:$0xff]   ;;  %v2749_v5 = vld [vmem:[#allocation7 + $0xec] ss:$16 sps:$4 sm:$0xff]   ;;  %v81_v6 = vpack.c.bf16 %v79_v3, %v79_v3  ;;  %v2751_v7 = vld [vmem:[#allocation7 + $0xe0] ss:$16 sps:$4 sm:$0xff]  }
  0x37   :  { %v2753_v8 = vld [vmem:[#allocation7 + $0xe8] ss:$16 sps:$4 sm:$0xff]   ;;  %v2755_v9 = vld [vmem:[#allocation7 + $0xc4] ss:$16 sps:$4 sm:$0xff]   ;;  %v2757_v10 = vld [vmem:[#allocation7 + $0xcc] ss:$16 sps:$4 sm:$0xff]  }
  0x38   :  { %v2761_v11 = vld [vmem:[#allocation7 + $0xc0] ss:$16 sps:$4 sm:$0xff]   ;;  %v2763_v12 = vld [vmem:[#allocation7 + $0xc8] ss:$16 sps:$4 sm:$0xff]   ;;  %v2765_v13 = vld [vmem:[#allocation7 + $0xa4] ss:$16 sps:$4 sm:$0xff]  }
  0x39   :  { %502 = vmatpush1.bf16.msra.mxu0 %v2380_v27  ;;  %543 = vmatpush1.bf16.msra.mxu1 %v2381_v28  ;;  %v2767_v14 = vld [vmem:[#allocation7 + $0xac] ss:$16 sps:$4 sm:$0xff]   ;;  %v2773_v15 = vld [vmem:[#allocation7 + $0xa0] ss:$16 sps:$4 sm:$0xff]   ;;  %v2775_v16 = vld [vmem:[#allocation7 + $0xa8] ss:$16 sps:$4 sm:$0xff]  }
  0x3a   :  { %503 = vmatprep.subr.bf16.mxu0 %v2382_v29  ;;  %544 = vmatprep.subr.bf16.mxu1 %v2384_v30  ;;  %v2779_v18 = vld [vmem:[#allocation7 + $0x84] ss:$16 sps:$4 sm:$0xff]   ;;  %v2781_v19 = vld [vmem:[#allocation7 + $0x8c] ss:$16 sps:$4 sm:$0xff]   ;;  %v2789_v20 = vld [vmem:[#allocation7 + $0x80] ss:$16 sps:$4 sm:$0xff]  }
  0x3b   :  { %v2791_v21 = vld [vmem:[#allocation7 + $0x88] ss:$16 sps:$4 sm:$0xff]   ;;  %v2795_v22 = vld [vmem:[#allocation7 + $0x64] ss:$16 sps:$4 sm:$0xff]   ;;  %v2797_v23 = vld [vmem:[#allocation7 + $0x6c] ss:$16 sps:$4 sm:$0xff]  }
  0x3c   :  { %v2801_v24 = vld [vmem:[#allocation7 + $0x60] ss:$16 sps:$4 sm:$0xff]   ;;  %v2803_v25 = vld [vmem:[#allocation7 + $0x68] ss:$16 sps:$4 sm:$0xff]   ;;  %v2807_v26 = vld [vmem:[#allocation7 + $0x44] ss:$16 sps:$4 sm:$0xff]  }
  0x3d   :  { %504 = vmatpush1.bf16.msra.mxu0 %v2386_v31  ;;  %545 = vmatpush1.bf16.msra.mxu1 %v2387_v32  ;;  %v2809_v27 = vld [vmem:[#allocation7 + $0x4c] ss:$16 sps:$4 sm:$0xff]   ;;  %v2813_v28 = vld [vmem:[#allocation7 + $0x40] ss:$16 sps:$4 sm:$0xff]   ;;  %v2815_v29 = vld [vmem:[#allocation7 + $0x48] ss:$16 sps:$4 sm:$0xff]  }
  0x3e   :  { %505 = vmatprep.subr.bf16.mxu0 %v2388_v33  ;;  %546 = vmatprep.subr.bf16.mxu1 %v2390_v34  ;;  %v2819_v30 = vld [vmem:[#allocation7 + $0x24] ss:$16 sps:$4 sm:$0xff]   ;;  %v2821_v31 = vld [vmem:[#allocation7 + $0x2c] ss:$16 sps:$4 sm:$0xff]   ;;  %v2825_v32 = vld [vmem:[#allocation7 + $0x20] ss:$16 sps:$4 sm:$0xff]  }
  0x3f   :  { %v2827_v33 = vld [vmem:[#allocation7 + $0x28] ss:$16 sps:$4 sm:$0xff]   ;;  %v2831_v34 = vld [vmem:[#allocation7 + $0x4] ss:$16 sps:$4 sm:$0xff]   ;;  %vm2136_vm7 = vcmask 0  }
  0x41   :  { %506 = vmatpush2.bf16.msra.mxu0 %v2392_v35  ;;  %547 = vmatpush2.bf16.msra.mxu1 %v2393_v36  ;;  %v2833_v35 = vld [vmem:[#allocation7 + $0xc] ss:$16 sps:$4 sm:$0xff]   ;;  %v2837_v36 = vld [vmem:[#allocation7] ss:$16 sps:$4 sm:$0xff]  }
  0x42   :  { %507 = vmatprep.subr.bf16.mxu0 %v2394_v37  ;;  %548 = vmatprep.subr.bf16.mxu1 %v2396_v38  ;;  %v2839_v37 = vld [vmem:[#allocation7 + $0x8] ss:$16 sps:$4 sm:$0xff]   ;;  %v149_v38 = vlaneseq }
  0x45   :  { %508 = vmatpush2.bf16.msra.mxu0 %v2398_v39  ;;  %549 = vmatpush2.bf16.msra.mxu1 %v2399_v40  ;;  %v150_v39 = vshrl.u32 %v149_v38, 7 }
  0x46   :  { %509 = vmatprep.subr.bf16.mxu0 %v2400_v41  ;;  %550 = vmatprep.subr.bf16.mxu1 %v2402_v42  ;;  %v147_v42 = vld [vmem:[%s3214_s3] sm:$0xf] }
  0x47   :  { %v151_v40 = vsub.s32 0, %v150_v39  ;;  %v159_v41 = vsub.s32 2, %v150_v39 }
  0x49   :  { %510 = vmatpush2.bf16.msra.mxu0 %v2404_v43  ;;  %551 = vmatpush2.bf16.msra.mxu1 %v2405_v44  ;;  %v155_v43 = vsub.s32 1, %v150_v39  ;;  %v163_v44 = vsub.s32 3, %v150_v39 }
  0x4a   :  { %511 = vmatprep.subr.bf16.mxu0 %v2406_v45  ;;  %552 = vmatprep.subr.bf16.mxu1 %v2408_v46  ;;  %v152_v45 = vrot.slane %v147_v42, %v151_v40  ;;  %v160_v46 = vrot.slane %v147_v42, %v159_v41 }
  0x4b   :  { %v156_v47 = vrot.slane %v147_v42, %v155_v43 }
  0x4d   :  { %512 = vmatpush2.bf16.msra.mxu0 %v2410_v48  ;;  %553 = vmatpush2.bf16.msra.mxu1 %v2411_v50  ;;  %v164_v48 = vrot.slane %v147_v42, %v163_v44 }
  0x4e   :  { %513 = vmatprep.subr.bf16.mxu0 %v2412_v51  ;;  %554 = vmatprep.subr.bf16.mxu1 %v2414_v52 }
  0x51   :  { %514 = vmatpush2.bf16.msra.mxu0 %v2416_v53  ;;  %555 = vmatpush2.bf16.msra.mxu1 %v2417_v54 }
  0x52   :  { %515 = vmatprep.subr.bf16.mxu0 %v2418_v55  ;;  %556 = vmatprep.subr.bf16.mxu1 %v2420_v56 }
  0x55   :  { %516 = vmatpush2.bf16.msra.mxu0 %v2422_v57  ;;  %557 = vmatpush2.bf16.msra.mxu1 %v2423_v58 }
  0x56   :  { %517 = vmatprep.subr.bf16.mxu0 %v2424_v59  ;;  %558 = vmatprep.subr.bf16.mxu1 %v2426_v60 }
  0x59   :  { %518 = vmatpush2.bf16.msra.mxu0 %v2428_v61  ;;  %559 = vmatpush2.bf16.msra.mxu1 %v2429_v62  ;;  %v2653_v61 = vmov 1966171168  }
  0x5a   :  { %519 = vmatprep.subr.bf16.mxu0 %v2430_v63  ;;  %560 = vmatprep.subr.bf16.mxu1 %v2432_v0  ;;  %v857_v62 = vunpack.c.l.s4 %v2653_v61 }
  0x5c   :  { %v858_v63 = vunpack.c.0.s8 %v857_v62 }
  0x5d   :  { %520 = vmatpush2.bf16.msra.mxu0 %v2434_v1  ;;  %561 = vmatpush2.bf16.msra.mxu1 %v2435_v2 }
  0x5e   :  { %768 = vmatprep.subr.bf16.mxu0 %v2747_v4  ;;  %809 = vmatprep.subr.bf16.mxu1 %v2749_v5  ;;  %v2886_v2 = vsub.s32 %v858_v63, %v150_v39 }
  0x60   :  { %522 = vmatmul.mubr.bf16.vlgmr.msra.gmra.mxu0 %v81_v6  ;;  %563 = vmatmul.mubr.bf16.vlgmr.msra.gmra.mxu1 %v81_v6 }
  0x61   :  { %769 = vmatpush1.bf16.msra.mxu0 %v2751_v7  ;;  %810 = vmatpush1.bf16.msra.mxu1 %v2753_v8 }
  0x62   :  { %770 = vmatprep.subr.bf16.mxu0 %v2755_v9  ;;  %811 = vmatprep.subr.bf16.mxu1 %v2757_v10 }
  0x63   :  { %800 = vmatprep.mubr.bf16.mxu0 %v2652_v17  ;;  %841 = vmatprep.mubr.bf16.mxu1 %v2652_v17 }
  0x65   :  { %771 = vmatpush1.bf16.msra.mxu0 %v2761_v11  ;;  %812 = vmatpush1.bf16.msra.mxu1 %v2763_v12 }
  0x66   :  { %772 = vmatprep.subr.bf16.mxu0 %v2765_v13  ;;  %813 = vmatprep.subr.bf16.mxu1 %v2767_v14 }
  0x69   :  { %773 = vmatpush1.bf16.msra.mxu0 %v2773_v15  ;;  %814 = vmatpush1.bf16.msra.mxu1 %v2775_v16 }
  0x6a   :  { %774 = vmatprep.subr.bf16.mxu0 %v2779_v18  ;;  %815 = vmatprep.subr.bf16.mxu1 %v2781_v19 }
  0x6d   :  { %775 = vmatpush1.bf16.msra.mxu0 %v2789_v20  ;;  %816 = vmatpush1.bf16.msra.mxu1 %v2791_v21 }
  0x6e   :  { %776 = vmatprep.subr.bf16.mxu0 %v2795_v22  ;;  %817 = vmatprep.subr.bf16.mxu1 %v2797_v23 }
  0x71   :  { %777 = vmatpush1.bf16.msra.mxu0 %v2801_v24  ;;  %818 = vmatpush1.bf16.msra.mxu1 %v2803_v25 }
  0x72   :  { %778 = vmatprep.subr.bf16.mxu0 %v2807_v26  ;;  %819 = vmatprep.subr.bf16.mxu1 %v2809_v27 }
  0x75   :  { %779 = vmatpush1.bf16.msra.mxu0 %v2813_v28  ;;  %820 = vmatpush1.bf16.msra.mxu1 %v2815_v29 }
  0x76   :  { %780 = vmatprep.subr.bf16.mxu0 %v2819_v30  ;;  %821 = vmatprep.subr.bf16.mxu1 %v2821_v31 }
  0x79   :  { %781 = vmatpush1.bf16.msra.mxu0 %v2825_v32  ;;  %822 = vmatpush1.bf16.msra.mxu1 %v2827_v33 }
  0x7a   :  { %782 = vmatprep.subr.bf16.mxu0 %v2831_v34  ;;  %823 = vmatprep.subr.bf16.mxu1 %v2833_v35 }
  0x7d   :  { %783 = vmatpush1.bf16.msra.mxu0 %v2837_v36  ;;  %824 = vmatpush1.bf16.msra.mxu1 %v2839_v37 }
  0x7e   :  { %903 = vmatprep.subr.bf16.mxu0 %v2747_v4  ;;  %944 = vmatprep.subr.bf16.mxu1 %v2749_v5 }
  0x80   :  { %801 = vmatmul.mubr.bf16.vlgmr.msra.gmra.mxu0 %v2652_v17  ;;  %842 = vmatmul.mubr.bf16.vlgmr.msra.gmra.mxu1 %v2652_v17 }
  0x81   :  { %904 = vmatpush1.bf16.msra.mxu0 %v2751_v7  ;;  %945 = vmatpush1.bf16.msra.mxu1 %v2753_v8 }
  0x82   :  { %905 = vmatprep.subr.bf16.mxu0 %v2755_v9  ;;  %946 = vmatprep.subr.bf16.mxu1 %v2757_v10 }
  0x83   :  { %935 = vmatprep.mubr.bf16.mxu0 %v2652_v17  ;;  %976 = vmatprep.mubr.bf16.mxu1 %v2652_v17 }
  0x85   :  { %906 = vmatpush1.bf16.msra.mxu0 %v2761_v11  ;;  %947 = vmatpush1.bf16.msra.mxu1 %v2763_v12 }
  0x86   :  { %907 = vmatprep.subr.bf16.mxu0 %v2765_v13  ;;  %948 = vmatprep.subr.bf16.mxu1 %v2767_v14 }
  0x89   :  { %908 = vmatpush1.bf16.msra.mxu0 %v2773_v15  ;;  %949 = vmatpush1.bf16.msra.mxu1 %v2775_v16 }
  0x8a   :  { %909 = vmatprep.subr.bf16.mxu0 %v2779_v18  ;;  %950 = vmatprep.subr.bf16.mxu1 %v2781_v19 }
  0x8d   :  { %910 = vmatpush1.bf16.msra.mxu0 %v2789_v20  ;;  %951 = vmatpush1.bf16.msra.mxu1 %v2791_v21 }
  0x8e   :  { %911 = vmatprep.subr.bf16.mxu0 %v2795_v22  ;;  %952 = vmatprep.subr.bf16.mxu1 %v2797_v23 }
  0x91   :  { %912 = vmatpush1.bf16.msra.mxu0 %v2801_v24  ;;  %953 = vmatpush1.bf16.msra.mxu1 %v2803_v25 }
  0x92   :  { %913 = vmatprep.subr.bf16.mxu0 %v2807_v26  ;;  %954 = vmatprep.subr.bf16.mxu1 %v2809_v27 }
  0x95   :  { %914 = vmatpush1.bf16.msra.mxu0 %v2813_v28  ;;  %955 = vmatpush1.bf16.msra.mxu1 %v2815_v29 }
  0x96   :  { %915 = vmatprep.subr.bf16.mxu0 %v2819_v30  ;;  %956 = vmatprep.subr.bf16.mxu1 %v2821_v31 }
  0x99   :  { %916 = vmatpush1.bf16.msra.mxu0 %v2825_v32  ;;  %957 = vmatpush1.bf16.msra.mxu1 %v2827_v33 }
  0x9a   :  { %917 = vmatprep.subr.bf16.mxu0 %v2831_v34  ;;  %958 = vmatprep.subr.bf16.mxu1 %v2833_v35 }
  0x9d   :  { %918 = vmatpush1.bf16.msra.mxu0 %v2837_v36  ;;  %959 = vmatpush1.bf16.msra.mxu1 %v2839_v37 }
  0x9e   :  { %1038 = vmatprep.subr.bf16.mxu0 %v2747_v4  ;;  %1079 = vmatprep.subr.bf16.mxu1 %v2749_v5 }
 0x120   :  { %v523_v49 = vpop.f32.mrf.mxu0  ;;  %v564_v50 = vpop.f32.mrf.mxu1 }
 0x121   :  { %v524_v51 = vadd.f32 %v523_v49, %v152_v45  ;;  %v565_v52 = vadd.f32 %v564_v50, %v160_v46 }
 0x122   :  { %v525_v53 = vpop.f32.mrf.mxu0  ;;  %v566_v54 = vpop.f32.mrf.mxu1 }
 0x123   :  { %571 = vst [vmem:[#allocation2] sm:$0xff] %v524_v51  ;;  %573 = vst [vmem:[#allocation2 + $0x10] sm:$0xff] %v565_v52  ;;  %v526_v55 = vadd.f32 %v525_v53, %v156_v47  ;;  %v567_v56 = vadd.f32 %v566_v54, %v164_v48 }
 0x124   :  { %v527_v57 = vpop.f32.mrf.mxu0  ;;  %v568_v58 = vpop.f32.mrf.mxu1 }
 0x125   :  { %572 = vst [vmem:[#allocation2 + $0x8] sm:$0xff] %v526_v55  ;;  %574 = vst [vmem:[#allocation2 + $0x18] sm:$0xff] %v567_v56 }
 0x126   :  { %v528_v59 = vpop.f32.mrf.mxu0  ;;  %v569_v60 = vpop.f32.mrf.mxu1 }
 0x12c   :  { %v607_v49 = vld [vmem:[#allocation2] ss:$8 sm:$0xf] }
 0x140   :  { %v802_v0 = vpop.f32.mrf.mxu0  ;;  %v843_v1 = vpop.f32.mrf.mxu1 }
 0x142   :  { %v804_v3 = vpop.f32.mrf.mxu0  ;;  %v845_v6 = vpop.f32.mrf.mxu1 }
 0x143   :  { %v854_v38 = vcombine.low %v802_v0, %v804_v3  ;;  %v855_v40 = vcombine.low %v843_v1, %v845_v6 }
 0x144   :  { %v806_v41 = vpop.f32.mrf.mxu0  ;;  %v847_v42 = vpop.f32.mrf.mxu1 }
 0x145   :  { %v862_v43 = vrot.slane %v854_v38, %v2886_v2  ;;  %v869_v44 = vrot.slane %v855_v40, %v2886_v2 }
 0x146   :  { %v807_v45 = vpop.f32.mrf.mxu0  ;;  %v848_v46 = vpop.f32.mrf.mxu1 }
 0x147   :  { %v870_v47 = vcombine.low %v862_v43, %v869_v44 }
 0x149   :  { %v877_v48 = vrot.slane %v870_v47, %v2886_v2 }
 0x14b   :  { %v879_v50 = vadd.f32 %v877_v48, %v607_v49  ;;  %v901_v49 = vld [vmem:[#allocation2 + $0x1] ss:$8 sm:$0xf] }
 0x14d   :  { %v2250_v51 = vmul.f32 -1.442695, %v879_v50  ;;  %v887_v53 = vrot.slane %v879_v50, 3 }
 0x14f   :  { %2498 = vpow2.f32 %v2250_v51 }
 0x15c   :  { %v2499_v39 = vpop.eup %2498 }
 0x15d   :  { %v883_v52 = vadd.f32 1.0, %v2499_v39 }
 0x15f   :  { %2500 = vrcp.f32 %v883_v52 }
 0x160   :  { %2502 = vtanh.f32 %v887_v53 }
 0x16c   :  { %v2501_v54 = vpop.eup %2500 }
 0x16d   :  { %v891_v55 = vrot.slane %v2501_v54, 1  ;;  %v2503_v56 = vpop.eup %2502  ;;  %v897_v60 = vrot.slane %v2501_v54, 2 }
 0x16e   :  { %v894_v57 = vmul.f32 %v2503_v56, %v2501_v54 }
 0x16f   :  { %v893_v58 = vmul.f32 0.0, %v891_v55 }
 0x171   :  { %v2891_v59 = vadd.f32 %v894_v57, %v893_v58 }
 0x173   :  { %2504 = vtanh.f32 %v2891_v59 }
 0x180   :  { %v2505_v61 = vpop.eup %2504 }
 0x181   :  { %v899_v62 = vmul.f32 %v2505_v61, %v897_v60 }
 0x183   :  { %v902_v63 = vpack.c.bf16 %v899_v62, %v899_v62 }
 0x185   :  { %936 = vmatmul.mubr.bf16.vlgmr.msra.gmra.mxu0 %v902_v63  ;;  %977 = vmatmul.mubr.bf16.vlgmr.msra.gmra.mxu1 %v902_v63 }
 0x186   :  { %1039 = vmatpush1.bf16.msra.mxu0 %v2751_v7  ;;  %1080 = vmatpush1.bf16.msra.mxu1 %v2753_v8 }
 0x187   :  { %1040 = vmatprep.subr.bf16.mxu0 %v2755_v9  ;;  %1081 = vmatprep.subr.bf16.mxu1 %v2757_v10 }
 0x188   :  { %1070 = vmatprep.mubr.bf16.mxu0 %v2652_v17  ;;  %1111 = vmatprep.mubr.bf16.mxu1 %v2652_v17 }
 0x18a   :  { %1041 = vmatpush1.bf16.msra.mxu0 %v2761_v11  ;;  %1082 = vmatpush1.bf16.msra.mxu1 %v2763_v12 }
 0x18b   :  { %1042 = vmatprep.subr.bf16.mxu0 %v2765_v13  ;;  %1083 = vmatprep.subr.bf16.mxu1 %v2767_v14 }
 0x18e   :  { %1043 = vmatpush1.bf16.msra.mxu0 %v2773_v15  ;;  %1084 = vmatpush1.bf16.msra.mxu1 %v2775_v16 }
 0x18f   :  { %1044 = vmatprep.subr.bf16.mxu0 %v2779_v18  ;;  %1085 = vmatprep.subr.bf16.mxu1 %v2781_v19 }
 0x192   :  { %1045 = vmatpush1.bf16.msra.mxu0 %v2789_v20  ;;  %1086 = vmatpush1.bf16.msra.mxu1 %v2791_v21 }
 0x193   :  { %1046 = vmatprep.subr.bf16.mxu0 %v2795_v22  ;;  %1087 = vmatprep.subr.bf16.mxu1 %v2797_v23 }
 0x196   :  { %1047 = vmatpush1.bf16.msra.mxu0 %v2801_v24  ;;  %1088 = vmatpush1.bf16.msra.mxu1 %v2803_v25 }
 0x197   :  { %1048 = vmatprep.subr.bf16.mxu0 %v2807_v26  ;;  %1089 = vmatprep.subr.bf16.mxu1 %v2809_v27 }
 0x19a   :  { %1049 = vmatpush1.bf16.msra.mxu0 %v2813_v28  ;;  %1090 = vmatpush1.bf16.msra.mxu1 %v2815_v29 }
 0x19b   :  { %1050 = vmatprep.subr.bf16.mxu0 %v2819_v30  ;;  %1091 = vmatprep.subr.bf16.mxu1 %v2821_v31 }
 0x19e   :  { %1051 = vmatpush1.bf16.msra.mxu0 %v2825_v32  ;;  %1092 = vmatpush1.bf16.msra.mxu1 %v2827_v33 }
 0x19f   :  { %1052 = vmatprep.subr.bf16.mxu0 %v2831_v34  ;;  %1093 = vmatprep.subr.bf16.mxu1 %v2833_v35 }
 0x1a2   :  { %1053 = vmatpush1.bf16.msra.mxu0 %v2837_v36  ;;  %1094 = vmatpush1.bf16.msra.mxu1 %v2839_v37 }
 0x1a3   :  { %1173 = vmatprep.subr.bf16.mxu0 %v2747_v4  ;;  %1214 = vmatprep.subr.bf16.mxu1 %v2749_v5 }
 0x245   :  { %v937_v0 = vpop.f32.mrf.mxu0  ;;  %v978_v1 = vpop.f32.mrf.mxu1 }
 0x247   :  { %v939_v3 = vpop.f32.mrf.mxu0  ;;  %v980_v6 = vpop.f32.mrf.mxu1 }
 0x248   :  { %v989_v38 = vcombine.low %v937_v0, %v939_v3  ;;  %v990_v40 = vcombine.low %v978_v1, %v980_v6 }
 0x249   :  { %v941_v41 = vpop.f32.mrf.mxu0  ;;  %v982_v42 = vpop.f32.mrf.mxu1 }
 0x24a   :  { %v997_v43 = vrot.slane %v989_v38, %v2886_v2  ;;  %v1004_v44 = vrot.slane %v990_v40, %v2886_v2 }
 0x24b   :  { %v942_v45 = vpop.f32.mrf.mxu0  ;;  %v983_v46 = vpop.f32.mrf.mxu1 }
 0x24c   :  { %v1005_v47 = vcombine.low %v997_v43, %v1004_v44 }
 0x24e   :  { %v1012_v48 = vrot.slane %v1005_v47, %v2886_v2 }
 0x250   :  { %v1014_v50 = vadd.f32 %v1012_v48, %v901_v49  ;;  %v1036_v49 = vld [vmem:[#allocation2 + $0x2] ss:$8 sm:$0xf] }
 0x252   :  { %v2251_v51 = vmul.f32 -1.442695, %v1014_v50  ;;  %v1022_v53 = vrot.slane %v1014_v50, 3 }
 0x254   :  { %2506 = vpow2.f32 %v2251_v51 }
 0x261   :  { %v2507_v39 = vpop.eup %2506 }
 0x262   :  { %v1018_v52 = vadd.f32 1.0, %v2507_v39 }
 0x264   :  { %2508 = vrcp.f32 %v1018_v52 }
 0x265   :  { %2510 = vtanh.f32 %v1022_v53 }
 0x271   :  { %v2509_v54 = vpop.eup %2508 }
 0x272   :  { %v1026_v55 = vrot.slane %v2509_v54, 1  ;;  %v2511_v56 = vpop.eup %2510  ;;  %v1032_v61 = vrot.slane %v2509_v54, 2 }
 0x273   :  { %v1029_v57 = vmul.f32 %v2511_v56, %v2509_v54 }
 0x274   :  { %v1028_v58 = vmul.f32 %v1026_v55, %v2891_v59 }
 0x276   :  { %v2932_v60 = vadd.f32 %v1029_v57, %v1028_v58 }
 0x278   :  { %2512 = vtanh.f32 %v2932_v60 }
 0x285   :  { %v2513_v62 = vpop.eup %2512 }
 0x286   :  { %v1034_v63 = vmul.f32 %v2513_v62, %v1032_v61 }
 0x288   :  { %v1037_v0 = vpack.c.bf16 %v1034_v63, %v1034_v63 }
 0x28a   :  { %1071 = vmatmul.mubr.bf16.vlgmr.msra.gmra.mxu0 %v1037_v0  ;;  %1112 = vmatmul.mubr.bf16.vlgmr.msra.gmra.mxu1 %v1037_v0 }
 0x28b   :  { %1174 = vmatpush1.bf16.msra.mxu0 %v2751_v7  ;;  %1215 = vmatpush1.bf16.msra.mxu1 %v2753_v8 }
 0x28c   :  { %1175 = vmatprep.subr.bf16.mxu0 %v2755_v9  ;;  %1216 = vmatprep.subr.bf16.mxu1 %v2757_v10 }
 0x28d   :  { %1205 = vmatprep.mubr.bf16.mxu0 %v2652_v17  ;;  %1246 = vmatprep.mubr.bf16.mxu1 %v2652_v17 }
 0x28f   :  { %1176 = vmatpush1.bf16.msra.mxu0 %v2761_v11  ;;  %1217 = vmatpush1.bf16.msra.mxu1 %v2763_v12 }
 0x290   :  { %1177 = vmatprep.subr.bf16.mxu0 %v2765_v13  ;;  %1218 = vmatprep.subr.bf16.mxu1 %v2767_v14 }
 0x293   :  { %1178 = vmatpush1.bf16.msra.mxu0 %v2773_v15  ;;  %1219 = vmatpush1.bf16.msra.mxu1 %v2775_v16 }
 0x294   :  { %1179 = vmatprep.subr.bf16.mxu0 %v2779_v18  ;;  %1220 = vmatprep.subr.bf16.mxu1 %v2781_v19 }
 0x297   :  { %1180 = vmatpush1.bf16.msra.mxu0 %v2789_v20  ;;  %1221 = vmatpush1.bf16.msra.mxu1 %v2791_v21 }
 0x298   :  { %1181 = vmatprep.subr.bf16.mxu0 %v2795_v22  ;;  %1222 = vmatprep.subr.bf16.mxu1 %v2797_v23 }
 0x29b   :  { %1182 = vmatpush1.bf16.msra.mxu0 %v2801_v24  ;;  %1223 = vmatpush1.bf16.msra.mxu1 %v2803_v25 }
 0x29c   :  { %1183 = vmatprep.subr.bf16.mxu0 %v2807_v26  ;;  %1224 = vmatprep.subr.bf16.mxu1 %v2809_v27 }
 0x29f   :  { %1184 = vmatpush1.bf16.msra.mxu0 %v2813_v28  ;;  %1225 = vmatpush1.bf16.msra.mxu1 %v2815_v29 }
 0x2a0   :  { %1185 = vmatprep.subr.bf16.mxu0 %v2819_v30  ;;  %1226 = vmatprep.subr.bf16.mxu1 %v2821_v31 }
 0x2a3   :  { %1186 = vmatpush1.bf16.msra.mxu0 %v2825_v32  ;;  %1227 = vmatpush1.bf16.msra.mxu1 %v2827_v33 }
 0x2a4   :  { %1187 = vmatprep.subr.bf16.mxu0 %v2831_v34  ;;  %1228 = vmatprep.subr.bf16.mxu1 %v2833_v35 }
 0x2a7   :  { %1188 = vmatpush1.bf16.msra.mxu0 %v2837_v36  ;;  %1229 = vmatpush1.bf16.msra.mxu1 %v2839_v37 }
 0x2a8   :  { %1308 = vmatprep.subr.bf16.mxu0 %v2747_v4  ;;  %1349 = vmatprep.subr.bf16.mxu1 %v2749_v5 }
 0x34a   :  { %v1072_v59 = vpop.f32.mrf.mxu0  ;;  %v1113_v1 = vpop.f32.mrf.mxu1 }
 0x34c   :  { %v1074_v3 = vpop.f32.mrf.mxu0  ;;  %v1115_v6 = vpop.f32.mrf.mxu1 }
 0x34d   :  { %v1124_v38 = vcombine.low %v1072_v59, %v1074_v3  ;;  %v1125_v40 = vcombine.low %v1113_v1, %v1115_v6 }
 0x34e   :  { %v1076_v41 = vpop.f32.mrf.mxu0  ;;  %v1117_v42 = vpop.f32.mrf.mxu1 }
 0x34f   :  { %v1132_v43 = vrot.slane %v1124_v38, %v2886_v2  ;;  %v1139_v44 = vrot.slane %v1125_v40, %v2886_v2 }
 0x350   :  { %v1077_v45 = vpop.f32.mrf.mxu0  ;;  %v1118_v46 = vpop.f32.mrf.mxu1 }
 0x351   :  { %v1140_v47 = vcombine.low %v1132_v43, %v1139_v44 }
 0x353   :  { %v1147_v48 = vrot.slane %v1140_v47, %v2886_v2 }
 0x355   :  { %v1149_v50 = vadd.f32 %v1147_v48, %v1036_v49  ;;  %v1171_v49 = vld [vmem:[#allocation2 + $0x3] ss:$8 sm:$0xf] }
 0x357   :  { %v2252_v51 = vmul.f32 -1.442695, %v1149_v50  ;;  %v1157_v53 = vrot.slane %v1149_v50, 3 }
 0x359   :  { %2514 = vpow2.f32 %v2252_v51 }
 0x366   :  { %v2515_v39 = vpop.eup %2514 }
 0x367   :  { %v1153_v52 = vadd.f32 1.0, %v2515_v39 }
 0x369   :  { %2516 = vrcp.f32 %v1153_v52 }
 0x36a   :  { %2518 = vtanh.f32 %v1157_v53 }
 0x376   :  { %v2517_v54 = vpop.eup %2516 }
 0x377   :  { %v1161_v55 = vrot.slane %v2517_v54, 1  ;;  %v2519_v56 = vpop.eup %2518  ;;  %v1167_v62 = vrot.slane %v2517_v54, 2 }
 0x378   :  { %v1164_v57 = vmul.f32 %v2519_v56, %v2517_v54 }
 0x379   :  { %v1163_v58 = vmul.f32 %v1161_v55, %v2932_v60 }
 0x37b   :  { %v2973_v61 = vadd.f32 %v1164_v57, %v1163_v58 }
 0x37d   :  { %2520 = vtanh.f32 %v2973_v61 }
 0x38a   :  { %v2521_v63 = vpop.eup %2520 }
 0x38b   :  { %v1169_v0 = vmul.f32 %v2521_v63, %v1167_v62 }
 0x38d   :  { %v1172_v59 = vpack.c.bf16 %v1169_v0, %v1169_v0 }
 0x38f   :  { %1206 = vmatmul.mubr.bf16.vlgmr.msra.gmra.mxu0 %v1172_v59  ;;  %1247 = vmatmul.mubr.bf16.vlgmr.msra.gmra.mxu1 %v1172_v59 }
 0x390   :  { %1309 = vmatpush1.bf16.msra.mxu0 %v2751_v7  ;;  %1350 = vmatpush1.bf16.msra.mxu1 %v2753_v8 }
 0x391   :  { %1310 = vmatprep.subr.bf16.mxu0 %v2755_v9  ;;  %1351 = vmatprep.subr.bf16.mxu1 %v2757_v10 }
 0x392   :  { %1340 = vmatprep.mubr.bf16.mxu0 %v2652_v17  ;;  %1381 = vmatprep.mubr.bf16.mxu1 %v2652_v17 }
 0x394   :  { %1311 = vmatpush1.bf16.msra.mxu0 %v2761_v11  ;;  %1352 = vmatpush1.bf16.msra.mxu1 %v2763_v12 }
 0x395   :  { %1312 = vmatprep.subr.bf16.mxu0 %v2765_v13  ;;  %1353 = vmatprep.subr.bf16.mxu1 %v2767_v14 }
 0x398   :  { %1313 = vmatpush1.bf16.msra.mxu0 %v2773_v15  ;;  %1354 = vmatpush1.bf16.msra.mxu1 %v2775_v16 }
 0x399   :  { %1314 = vmatprep.subr.bf16.mxu0 %v2779_v18  ;;  %1355 = vmatprep.subr.bf16.mxu1 %v2781_v19 }
 0x39c   :  { %1315 = vmatpush1.bf16.msra.mxu0 %v2789_v20  ;;  %1356 = vmatpush1.bf16.msra.mxu1 %v2791_v21 }
 0x39d   :  { %1316 = vmatprep.subr.bf16.mxu0 %v2795_v22  ;;  %1357 = vmatprep.subr.bf16.mxu1 %v2797_v23 }
 0x3a0   :  { %1317 = vmatpush1.bf16.msra.mxu0 %v2801_v24  ;;  %1358 = vmatpush1.bf16.msra.mxu1 %v2803_v25 }
 0x3a1   :  { %1318 = vmatprep.subr.bf16.mxu0 %v2807_v26  ;;  %1359 = vmatprep.subr.bf16.mxu1 %v2809_v27 }
 0x3a4   :  { %1319 = vmatpush1.bf16.msra.mxu0 %v2813_v28  ;;  %1360 = vmatpush1.bf16.msra.mxu1 %v2815_v29 }
 0x3a5   :  { %1320 = vmatprep.subr.bf16.mxu0 %v2819_v30  ;;  %1361 = vmatprep.subr.bf16.mxu1 %v2821_v31 }
 0x3a8   :  { %1321 = vmatpush1.bf16.msra.mxu0 %v2825_v32  ;;  %1362 = vmatpush1.bf16.msra.mxu1 %v2827_v33 }
 0x3a9   :  { %1322 = vmatprep.subr.bf16.mxu0 %v2831_v34  ;;  %1363 = vmatprep.subr.bf16.mxu1 %v2833_v35 }
 0x3ac   :  { %1323 = vmatpush1.bf16.msra.mxu0 %v2837_v36  ;;  %1364 = vmatpush1.bf16.msra.mxu1 %v2839_v37 }
 0x3ad   :  { %1443 = vmatprep.subr.bf16.mxu0 %v2747_v4  ;;  %1484 = vmatprep.subr.bf16.mxu1 %v2749_v5 }
 0x44f   :  { %v1207_v60 = vpop.f32.mrf.mxu0  ;;  %v1248_v1 = vpop.f32.mrf.mxu1 }
 0x451   :  { %v1209_v3 = vpop.f32.mrf.mxu0  ;;  %v1250_v6 = vpop.f32.mrf.mxu1 }
 0x452   :  { %v1259_v38 = vcombine.low %v1207_v60, %v1209_v3  ;;  %v1260_v40 = vcombine.low %v1248_v1, %v1250_v6 }
 0x453   :  { %v1211_v41 = vpop.f32.mrf.mxu0  ;;  %v1252_v42 = vpop.f32.mrf.mxu1 }
 0x454   :  { %v1267_v43 = vrot.slane %v1259_v38, %v2886_v2  ;;  %v1274_v44 = vrot.slane %v1260_v40, %v2886_v2 }
 0x455   :  { %v1212_v45 = vpop.f32.mrf.mxu0  ;;  %v1253_v46 = vpop.f32.mrf.mxu1 }
 0x456   :  { %v1275_v47 = vcombine.low %v1267_v43, %v1274_v44 }
 0x458   :  { %v1282_v48 = vrot.slane %v1275_v47, %v2886_v2 }
 0x45a   :  { %v1284_v50 = vadd.f32 %v1282_v48, %v1171_v49 }
 0x45c   :  { %v2253_v51 = vmul.f32 -1.442695, %v1284_v50  ;;  %v1292_v53 = vrot.slane %v1284_v50, 3 }
 0x45e   :  { %2522 = vpow2.f32 %v2253_v51 }
 0x46b   :  { %v2523_v39 = vpop.eup %2522 }
 0x46c   :  { %v1288_v52 = vadd.f32 1.0, %v2523_v39 }
 0x46e   :  { %2524 = vrcp.f32 %v1288_v52 }
 0x46f   :  { %2526 = vtanh.f32 %v1292_v53 }
 0x47b   :  { %v2525_v54 = vpop.eup %2524 }
 0x47c   :  { %v1296_v55 = vrot.slane %v2525_v54, 1  ;;  %v2527_v56 = vpop.eup %2526  ;;  %v1302_v63 = vrot.slane %v2525_v54, 2 }
 0x47d   :  { %v1299_v57 = vmul.f32 %v2527_v56, %v2525_v54 }
 0x47e   :  { %v1298_v58 = vmul.f32 %v1296_v55, %v2973_v61 }
 0x480   :  { %v3014_v62 = vadd.f32 %v1299_v57, %v1298_v58 }
 0x482   :  { %2528 = vtanh.f32 %v3014_v62 }
 0x48f   :  { %v2529_v0 = vpop.eup %2528 }
 0x490   :  { %v1304_v59 = vmul.f32 %v2529_v0, %v1302_v63 }
 0x492   :  { %v1307_v60 = vpack.c.bf16 %v1304_v59, %v1304_v59 }
 0x494   :  { %1341 = vmatmul.mubr.bf16.vlgmr.msra.gmra.mxu0 %v1307_v60  ;;  %1382 = vmatmul.mubr.bf16.vlgmr.msra.gmra.mxu1 %v1307_v60 }
 0x495   :  { %1444 = vmatpush1.bf16.msra.mxu0 %v2751_v7  ;;  %1485 = vmatpush1.bf16.msra.mxu1 %v2753_v8 }
 0x496   :  { %1445 = vmatprep.subr.bf16.mxu0 %v2755_v9  ;;  %1486 = vmatprep.subr.bf16.mxu1 %v2757_v10 }
 0x497   :  { %1475 = vmatprep.mubr.bf16.mxu0 %v2652_v17  ;;  %1516 = vmatprep.mubr.bf16.mxu1 %v2652_v17 }
 0x499   :  { %1446 = vmatpush1.bf16.msra.mxu0 %v2761_v11  ;;  %1487 = vmatpush1.bf16.msra.mxu1 %v2763_v12 }
 0x49a   :  { %1447 = vmatprep.subr.bf16.mxu0 %v2765_v13  ;;  %1488 = vmatprep.subr.bf16.mxu1 %v2767_v14 }
 0x49d   :  { %1448 = vmatpush1.bf16.msra.mxu0 %v2773_v15  ;;  %1489 = vmatpush1.bf16.msra.mxu1 %v2775_v16 }
 0x49e   :  { %1449 = vmatprep.subr.bf16.mxu0 %v2779_v18  ;;  %1490 = vmatprep.subr.bf16.mxu1 %v2781_v19 }
 0x4a1   :  { %1450 = vmatpush1.bf16.msra.mxu0 %v2789_v20  ;;  %1491 = vmatpush1.bf16.msra.mxu1 %v2791_v21 }
 0x4a2   :  { %1451 = vmatprep.subr.bf16.mxu0 %v2795_v22  ;;  %1492 = vmatprep.subr.bf16.mxu1 %v2797_v23 }
 0x4a5   :  { %1452 = vmatpush1.bf16.msra.mxu0 %v2801_v24  ;;  %1493 = vmatpush1.bf16.msra.mxu1 %v2803_v25 }
 0x4a6   :  { %1453 = vmatprep.subr.bf16.mxu0 %v2807_v26  ;;  %1494 = vmatprep.subr.bf16.mxu1 %v2809_v27 }
 0x4a9   :  { %1454 = vmatpush1.bf16.msra.mxu0 %v2813_v28  ;;  %1495 = vmatpush1.bf16.msra.mxu1 %v2815_v29 }
 0x4aa   :  { %1455 = vmatprep.subr.bf16.mxu0 %v2819_v30  ;;  %1496 = vmatprep.subr.bf16.mxu1 %v2821_v31 }
 0x4ad   :  { %1456 = vmatpush1.bf16.msra.mxu0 %v2825_v32  ;;  %1497 = vmatpush1.bf16.msra.mxu1 %v2827_v33 }
 0x4ae   :  { %1457 = vmatprep.subr.bf16.mxu0 %v2831_v34  ;;  %1498 = vmatprep.subr.bf16.mxu1 %v2833_v35 }
 0x4b1   :  { %1458 = vmatpush1.bf16.msra.mxu0 %v2837_v36  ;;  %1499 = vmatpush1.bf16.msra.mxu1 %v2839_v37 }
 0x4b2   :  { %1578 = vmatprep.subr.bf16.mxu0 %v2747_v4  ;;  %1619 = vmatprep.subr.bf16.mxu1 %v2749_v5  ;;  %v1306_v4 = vld [vmem:[#allocation2 + $0x4] ss:$8 sm:$0xf] }
 0x554   :  { %v1342_v61 = vpop.f32.mrf.mxu0  ;;  %v1383_v1 = vpop.f32.mrf.mxu1 }
 0x556   :  { %v1344_v3 = vpop.f32.mrf.mxu0  ;;  %v1385_v6 = vpop.f32.mrf.mxu1 }
 0x557   :  { %v1394_v38 = vcombine.low %v1342_v61, %v1344_v3  ;;  %v1395_v40 = vcombine.low %v1383_v1, %v1385_v6  ;;  %v1441_v3 = vld [vmem:[#allocation2 + $0x5] ss:$8 sm:$0xf] }
 0x558   :  { %v1346_v41 = vpop.f32.mrf.mxu0  ;;  %v1387_v42 = vpop.f32.mrf.mxu1 }
 0x559   :  { %v1402_v43 = vrot.slane %v1394_v38, %v2886_v2  ;;  %v1409_v44 = vrot.slane %v1395_v40, %v2886_v2 }
 0x55a   :  { %v1347_v45 = vpop.f32.mrf.mxu0  ;;  %v1388_v46 = vpop.f32.mrf.mxu1 }
 0x55b   :  { %v1410_v47 = vcombine.low %v1402_v43, %v1409_v44 }
 0x55d   :  { %v1417_v48 = vrot.slane %v1410_v47, %v2886_v2 }
 0x55f   :  { %v1419_v49 = vadd.f32 %v1417_v48, %v1306_v4 }
 0x561   :  { %v2254_v5 = vmul.f32 -1.442695, %v1419_v49  ;;  %v1427_v39 = vrot.slane %v1419_v49, 3 }
 0x563   :  { %2530 = vpow2.f32 %v2254_v5 }
 0x570   :  { %v2531_v50 = vpop.eup %2530 }
 0x571   :  { %v1423_v51 = vadd.f32 1.0, %v2531_v50 }
 0x573   :  { %2532 = vrcp.f32 %v1423_v51  ;;  %v2570_v51 = vld [vmem:[#allocation7 + $0xe0] ss:$16 sps:$4 sm:$0xff]  }
 0x574   :  { %2534 = vtanh.f32 %v1427_v39  ;;  %v2571_v39 = vld [vmem:[#allocation7 + $0xe8] ss:$16 sps:$4 sm:$0xff]  }
 0x580   :  { %v2533_v52 = vpop.eup %2532 }
 0x581   :  { %v1431_v53 = vrot.slane %v2533_v52, 1  ;;  %v2535_v54 = vpop.eup %2534  ;;  %v1437_v58 = vrot.slane %v2533_v52, 2 }
 0x582   :  { %v1434_v55 = vmul.f32 %v2535_v54, %v2533_v52  ;;  %v2572_v52 = vld [vmem:[#allocation7 + $0xc4] ss:$16 sps:$4 sm:$0xff]   ;;  %v2574_v54 = vld [vmem:[#allocation7 + $0xc0] ss:$16 sps:$4 sm:$0xff]  }
 0x583   :  { %v1433_v56 = vmul.f32 %v1431_v53, %v3014_v62  ;;  %v2573_v53 = vld [vmem:[#allocation7 + $0xcc] ss:$16 sps:$4 sm:$0xff]  }
 0x585   :  { %v3055_v57 = vadd.f32 %v1434_v55, %v1433_v56  ;;  %v2575_v55 = vld [vmem:[#allocation7 + $0xc8] ss:$16 sps:$4 sm:$0xff]   ;;  %v2576_v56 = vld [vmem:[#allocation7 + $0xa4] ss:$16 sps:$4 sm:$0xff]  }
 0x587   :  { %2536 = vtanh.f32 %v3055_v57 }
 0x594   :  { %v2537_v63 = vpop.eup %2536 }
 0x595   :  { %v1439_v0 = vmul.f32 %v2537_v63, %v1437_v58  ;;  %v2578_v58 = vld [vmem:[#allocation7 + $0xa0] ss:$16 sps:$4 sm:$0xff]   ;;  %v2579_v63 = vld [vmem:[#allocation7 + $0xa8] ss:$16 sps:$4 sm:$0xff]  }
 0x597   :  { %v1442_v59 = vpack.c.bf16 %v1439_v0, %v1439_v0  ;;  %v2580_v0 = vld [vmem:[#allocation7 + $0x84] ss:$16 sps:$4 sm:$0xff]  }
 0x599   :  { %1476 = vmatmul.mubr.bf16.vlgmr.msra.gmra.mxu0 %v1442_v59  ;;  %1517 = vmatmul.mubr.bf16.vlgmr.msra.gmra.mxu1 %v1442_v59  ;;  %v2581_v59 = vld [vmem:[#allocation7 + $0x8c] ss:$16 sps:$4 sm:$0xff]  }
 0x59a   :  { %1579 = vmatpush1.bf16.msra.mxu0 %v2751_v7  ;;  %1620 = vmatpush1.bf16.msra.mxu1 %v2753_v8  ;;  %v2568_v7 = vld [vmem:[#allocation7 + $0xe4] ss:$16 sps:$4 sm:$0xff]   ;;  %v2569_v8 = vld [vmem:[#allocation7 + $0xec] ss:$16 sps:$4 sm:$0xff]  }
 0x59b   :  { %1580 = vmatprep.subr.bf16.mxu0 %v2755_v9  ;;  %1621 = vmatprep.subr.bf16.mxu1 %v2757_v10 }
 0x59c   :  { %1610 = vmatprep.mubr.bf16.mxu0 %v2652_v17  ;;  %1651 = vmatprep.mubr.bf16.mxu1 %v2652_v17 }
 0x59e   :  { %1581 = vmatpush1.bf16.msra.mxu0 %v2761_v11  ;;  %1622 = vmatpush1.bf16.msra.mxu1 %v2763_v12 }
 0x59f   :  { %1582 = vmatprep.subr.bf16.mxu0 %v2765_v13  ;;  %1623 = vmatprep.subr.bf16.mxu1 %v2767_v14 }
 0x5a2   :  { %1583 = vmatpush1.bf16.msra.mxu0 %v2773_v15  ;;  %1624 = vmatpush1.bf16.msra.mxu1 %v2775_v16 }
 0x5a3   :  { %1584 = vmatprep.subr.bf16.mxu0 %v2779_v18  ;;  %1625 = vmatprep.subr.bf16.mxu1 %v2781_v19 }
 0x5a6   :  { %1585 = vmatpush1.bf16.msra.mxu0 %v2789_v20  ;;  %1626 = vmatpush1.bf16.msra.mxu1 %v2791_v21 }
 0x5a7   :  { %1586 = vmatprep.subr.bf16.mxu0 %v2795_v22  ;;  %1627 = vmatprep.subr.bf16.mxu1 %v2797_v23 }
 0x5aa   :  { %1587 = vmatpush1.bf16.msra.mxu0 %v2801_v24  ;;  %1628 = vmatpush1.bf16.msra.mxu1 %v2803_v25 }
 0x5ab   :  { %1588 = vmatprep.subr.bf16.mxu0 %v2807_v26  ;;  %1629 = vmatprep.subr.bf16.mxu1 %v2809_v27 }
 0x5ae   :  { %1589 = vmatpush1.bf16.msra.mxu0 %v2813_v28  ;;  %1630 = vmatpush1.bf16.msra.mxu1 %v2815_v29 }
 0x5af   :  { %1590 = vmatprep.subr.bf16.mxu0 %v2819_v30  ;;  %1631 = vmatprep.subr.bf16.mxu1 %v2821_v31 }
 0x5b2   :  { %1591 = vmatpush1.bf16.msra.mxu0 %v2825_v32  ;;  %1632 = vmatpush1.bf16.msra.mxu1 %v2827_v33 }
 0x5b3   :  { %1592 = vmatprep.subr.bf16.mxu0 %v2831_v34  ;;  %1633 = vmatprep.subr.bf16.mxu1 %v2833_v35 }
 0x5b6   :  { %1593 = vmatpush1.bf16.msra.mxu0 %v2837_v36  ;;  %1634 = vmatpush1.bf16.msra.mxu1 %v2839_v37 }
 0x5b7   :  { %1713 = vmatprep.subr.bf16.mxu0 %v2568_v7  ;;  %1754 = vmatprep.subr.bf16.mxu1 %v2569_v8 }
 0x659   :  { %v1477_v9 = vpop.f32.mrf.mxu0  ;;  %v1518_v10 = vpop.f32.mrf.mxu1 }
 0x65b   :  { %v1479_v11 = vpop.f32.mrf.mxu0  ;;  %v1520_v12 = vpop.f32.mrf.mxu1 }
 0x65c   :  { %v1529_v13 = vcombine.low %v1477_v9, %v1479_v11  ;;  %v1530_v14 = vcombine.low %v1518_v10, %v1520_v12 }
 0x65d   :  { %v1481_v15 = vpop.f32.mrf.mxu0  ;;  %v1522_v16 = vpop.f32.mrf.mxu1 }
 0x65e   :  { %v1537_v18 = vrot.slane %v1529_v13, %v2886_v2  ;;  %v1544_v19 = vrot.slane %v1530_v14, %v2886_v2 }
 0x65f   :  { %v1482_v62 = vpop.f32.mrf.mxu0  ;;  %v1523_v60 = vpop.f32.mrf.mxu1 }
 0x660   :  { %v1545_v61 = vcombine.low %v1537_v18, %v1544_v19  ;;  %v2484_v19 = vld [vmem:[%s3215_s4 + $0x38] sm:$0xff]   ;;  %v2654_v62 = vmov 0.0   ;;  %v2485_v60 = vld [vmem:[%s3215_s4 + $0x30] sm:$0xff]  }
 0x662   :  { %v1552_v1 = vrot.slane %v1545_v61, %v2886_v2  ;;  %v2486_v61 = vld [vmem:[%s3215_s4 + $0x28] sm:$0xff]  }
 0x664   :  { %v1554_v6 = vadd.f32 %v1552_v1, %v1441_v3  ;;  %v2487_v1 = vld [vmem:[%s3215_s4 + $0x20] sm:$0xff]   ;;  %v2488_v3 = vld [vmem:[%s3215_s4 + $0x18] sm:$0xff]  }
 0x666   :  { %v2255_v38 = vmul.f32 -1.442695, %v1554_v6  ;;  %v1562_v42 = vrot.slane %v1554_v6, 3  ;;  %v2489_v6 = vld [vmem:[%s3215_s4 + $0x10] sm:$0xff]  }
 0x668   :  { %2538 = vpow2.f32 %v2255_v38  ;;  %v2490_v38 = vld [vmem:[%s3215_s4 + $0x8] sm:$0xff]  }
 0x675   :  { %v2539_v40 = vpop.eup %2538 }
 0x676   :  { %v1558_v41 = vadd.f32 1.0, %v2539_v40  ;;  %v2491_v40 = vld [vmem:[%s3215_s4] sm:$0xff]  }
 0x678   :  { %2540 = vrcp.f32 %v1558_v41 }
 0x679   :  { %2542 = vtanh.f32 %v1562_v42 }
 0x685   :  { %v2541_v43 = vpop.eup %2540 }
 0x686   :  { %v1566_v44 = vrot.slane %v2541_v43, 1  ;;  %v2543_v45 = vpop.eup %2542  ;;  %v1572_v4 = vrot.slane %v2541_v43, 2 }
 0x687   :  { %v1569_v46 = vmul.f32 %v2543_v45, %v2541_v43 }
 0x688   :  { %v1568_v47 = vmul.f32 %v1566_v44, %v3055_v57  ;;  %v2577_v57 = vld [vmem:[#allocation7 + $0xac] ss:$16 sps:$4 sm:$0xff]  }
 0x68a   :  { %v3094_v48 = vadd.f32 %v1569_v46, %v1568_v47 }
 0x68c   :  { %2544 = vtanh.f32 %v3094_v48 }
 0x699   :  { %v2545_v49 = vpop.eup %2544 }
 0x69a   :  { %v1574_v5 = vmul.f32 %v2545_v49, %v1572_v4 }
 0x69c   :  { %v1577_v50 = vpack.c.bf16 %v1574_v5, %v1574_v5 }
 0x69e   :  { %1611 = vmatmul.mubr.bf16.vlgmr.msra.gmra.mxu0 %v1577_v50  ;;  %1652 = vmatmul.mubr.bf16.vlgmr.msra.gmra.mxu1 %v1577_v50 }
 0x69f   :  { %1714 = vmatpush1.bf16.msra.mxu0 %v2570_v51  ;;  %1755 = vmatpush1.bf16.msra.mxu1 %v2571_v39 }
 0x6a0   :  { %1715 = vmatprep.subr.bf16.mxu0 %v2572_v52  ;;  %1756 = vmatprep.subr.bf16.mxu1 %v2573_v53  ;;  %v1711_v52 = vld [vmem:[#allocation2 + $0x7] ss:$8 sm:$0xf] }
 0x6a1   :  { %1745 = vmatprep.mubr.bf16.mxu0 %v2652_v17  ;;  %1786 = vmatprep.mubr.bf16.mxu1 %v2652_v17 }
 0x6a3   :  { %1716 = vmatpush1.bf16.msra.mxu0 %v2574_v54  ;;  %1757 = vmatpush1.bf16.msra.mxu1 %v2575_v55 }
 0x6a4   :  { %1717 = vmatprep.subr.bf16.mxu0 %v2576_v56  ;;  %1758 = vmatprep.subr.bf16.mxu1 %v2577_v57 }
 0x6a7   :  { %1718 = vmatpush1.bf16.msra.mxu0 %v2578_v58  ;;  %1759 = vmatpush1.bf16.msra.mxu1 %v2579_v63 }
 0x6a8   :  { %1719 = vmatprep.subr.bf16.mxu0 %v2580_v0  ;;  %1760 = vmatprep.subr.bf16.mxu1 %v2581_v59 }
 0x6ab   :  { %1720 = vmatpush1.bf16.msra.mxu0 %v2789_v20  ;;  %1761 = vmatpush1.bf16.msra.mxu1 %v2791_v21 }
 0x6ac   :  { %1721 = vmatprep.subr.bf16.mxu0 %v2795_v22  ;;  %1762 = vmatprep.subr.bf16.mxu1 %v2797_v23 }
 0x6af   :  { %1722 = vmatpush1.bf16.msra.mxu0 %v2801_v24  ;;  %1763 = vmatpush1.bf16.msra.mxu1 %v2803_v25 }
 0x6b0   :  { %1723 = vmatprep.subr.bf16.mxu0 %v2807_v26  ;;  %1764 = vmatprep.subr.bf16.mxu1 %v2809_v27 }
 0x6b3   :  { %1724 = vmatpush1.bf16.msra.mxu0 %v2813_v28  ;;  %1765 = vmatpush1.bf16.msra.mxu1 %v2815_v29 }
 0x6b4   :  { %1725 = vmatprep.subr.bf16.mxu0 %v2819_v30  ;;  %1766 = vmatprep.subr.bf16.mxu1 %v2821_v31 }
 0x6b7   :  { %1726 = vmatpush1.bf16.msra.mxu0 %v2825_v32  ;;  %1767 = vmatpush1.bf16.msra.mxu1 %v2827_v33  ;;  %v1576_v33 = vld [vmem:[#allocation2 + $0x6] ss:$8 sm:$0xf] }
 0x6b8   :  { %1727 = vmatprep.subr.bf16.mxu0 %v2831_v34  ;;  %1768 = vmatprep.subr.bf16.mxu1 %v2833_v35 }
 0x6bb   :  { %1728 = vmatpush1.bf16.msra.mxu0 %v2837_v36  ;;  %1769 = vmatpush1.bf16.msra.mxu1 %v2839_v37 }
 0x6bc   :  { %2291 = vmatprep.subr.bf16.mxu0 %v2654_v62  ;;  %2311 = vmatprep.subr.bf16.mxu1 %v2654_v62 }
 0x75e   :  { %v1612_v17 = vpop.f32.mrf.mxu0  ;;  %v1653_v20 = vpop.f32.mrf.mxu1 }
 0x760   :  { %v1614_v21 = vpop.f32.mrf.mxu0  ;;  %v1655_v22 = vpop.f32.mrf.mxu1 }
 0x761   :  { %v1664_v23 = vcombine.low %v1612_v17, %v1614_v21  ;;  %v1665_v24 = vcombine.low %v1653_v20, %v1655_v22 }
 0x762   :  { %v1616_v25 = vpop.f32.mrf.mxu0  ;;  %v1657_v26 = vpop.f32.mrf.mxu1 }
 0x763   :  { %v1672_v27 = vrot.slane %v1664_v23, %v2886_v2  ;;  %v1679_v28 = vrot.slane %v1665_v24, %v2886_v2  ;;  %v1862_v24 = vld [vmem:[%s3216_s5] sm:$0x1] }
 0x764   :  { %v1617_v29 = vpop.f32.mrf.mxu0  ;;  %v1658_v30 = vpop.f32.mrf.mxu1 }
 0x765   :  { %v1680_v31 = vcombine.low %v1672_v27, %v1679_v28 }
 0x767   :  { %v1687_v32 = vrot.slane %v1680_v31, %v2886_v2 }
 0x769   :  { %v1689_v34 = vadd.f32 %v1687_v32, %v1576_v33 }
 0x76b   :  { %v2256_v35 = vmul.f32 -1.442695, %v1689_v34  ;;  %v1697_v7 = vrot.slane %v1689_v34, 3 }
 0x76d   :  { %2546 = vpow2.f32 %v2256_v35 }
 0x77a   :  { %v2547_v36 = vpop.eup %2546 }
 0x77b   :  { %v1693_v37 = vadd.f32 1.0, %v2547_v36  ;;  %v2492_v36 = vld [vmem:[%s3219_s8 + $0x18] sm:$0xff]  }
 0x77d   :  { %2548 = vrcp.f32 %v1693_v37  ;;  %v2493_v37 = vld [vmem:[%s3219_s8 + $0x10] sm:$0xff]  }
 0x77e   :  { %2550 = vtanh.f32 %v1697_v7  ;;  %v2494_v7 = vld [vmem:[%s3219_s8 + $0x8] sm:$0xff]  }
 0x78a   :  { %v2549_v8 = vpop.eup %2548 }
 0x78b   :  { %v1701_v9 = vrot.slane %v2549_v8, 1  ;;  %v2551_v10 = vpop.eup %2550  ;;  %v1707_v14 = vrot.slane %v2549_v8, 2 }
 0x78c   :  { %v1704_v11 = vmul.f32 %v2551_v10, %v2549_v8  ;;  %v2495_v8 = vld [vmem:[%s3219_s8] sm:$0xff]  }
 0x78d   :  { %v1703_v12 = vmul.f32 %v1701_v9, %v3094_v48 }
 0x78f   :  { %v3121_v13 = vadd.f32 %v1704_v11, %v1703_v12 }
 0x791   :  { %2552 = vtanh.f32 %v3121_v13 }
 0x79e   :  { %v2553_v15 = vpop.eup %2552 }
 0x79f   :  { %v1709_v16 = vmul.f32 %v2553_v15, %v1707_v14  ;;  %v1952_v15 = vld [vmem:[%s3218_s7] sm:$0x1] }
 0x7a1   :  { %v1712_v18 = vpack.c.bf16 %v1709_v16, %v1709_v16 }
 0x7a3   :  { %1746 = vmatmul.mubr.bf16.vlgmr.msra.gmra.mxu0 %v1712_v18  ;;  %1787 = vmatmul.mubr.bf16.vlgmr.msra.gmra.mxu1 %v1712_v18 }
 0x7a4   :  { %2307 = vmatprep.mubr.msk.bf16.mxu0 %vm2655_vm0, %v2654_v62  ;;  %2292 = vmatpush3.bf16.msra.mxu0 %v2484_v19 }
 0x7a5   :  { %2293 = vmatprep.subr.bf16.mxu0 %v2654_v62  ;;  %2319 = vmatprep.mubr.msk.bf16.mxu1 %vm2655_vm0, %v2654_v62 }
 0x7a6   :  { %2312 = vmatpush3.bf16.msra.mxu1 %v2492_v36 }
 0x7a7   :  { %2313 = vmatprep.subr.bf16.mxu1 %v2654_v62 }
 0x7a8   :  { %2294 = vmatpush3.bf16.msra.mxu0 %v2485_v60 }
 0x7a9   :  { %2295 = vmatprep.subr.bf16.mxu0 %v2654_v62 }
 0x7aa   :  { %2314 = vmatpush3.bf16.msra.mxu1 %v2493_v37 }
 0x7ab   :  { %2315 = vmatprep.subr.bf16.mxu1 %v2654_v62 }
 0x7ac   :  { %2296 = vmatpush3.bf16.msra.mxu0 %v2486_v61 }
 0x7ad   :  { %2297 = vmatprep.subr.bf16.mxu0 %v2654_v62 }
 0x7ae   :  { %2316 = vmatpush3.bf16.msra.mxu1 %v2494_v7 }
 0x7af   :  { %2317 = vmatprep.subr.bf16.mxu1 %v2654_v62 }
 0x7b0   :  { %2298 = vmatpush3.bf16.msra.mxu0 %v2487_v1  ;;  %v1982_v1 = vld [vmem:[%s3220_s9] sm:$0x1] }
 0x7b1   :  { %2299 = vmatprep.subr.bf16.mxu0 %v2654_v62 }
 0x7b2   :  { %2318 = vmatpush3.bf16.msra.mxu1 %v2495_v8 }
 0x7b3   :  { %2323 = vmatprep.subr.bf16.mxu1 %v2654_v62 }
 0x7b4   :  { %2300 = vmatpush3.bf16.msra.mxu0 %v2488_v3 }
 0x7b5   :  { %2301 = vmatprep.subr.bf16.mxu0 %v2654_v62 }
 0x7b8   :  { %2302 = vmatpush3.bf16.msra.mxu0 %v2489_v6 }
 0x7b9   :  { %2303 = vmatprep.subr.bf16.mxu0 %v2654_v62 }
 0x7bc   :  { %2304 = vmatpush3.bf16.msra.mxu0 %v2490_v38 }
 0x7bd   :  { %2305 = vmatprep.subr.bf16.mxu0 %v2654_v62 }
 0x7c0   :  { %2306 = vmatpush3.bf16.msra.mxu0 %v2491_v40 }
 0x863   :  { %v1747_v41 = vpop.f32.mrf.mxu0  ;;  %v1788_v42 = vpop.f32.mrf.mxu1 }
 0x865   :  { %v1749_v43 = vpop.f32.mrf.mxu0  ;;  %v1790_v44 = vpop.f32.mrf.mxu1 }
 0x866   :  { %v1799_v45 = vcombine.low %v1747_v41, %v1749_v43  ;;  %v1800_v46 = vcombine.low %v1788_v42, %v1790_v44 }
 0x867   :  { %v1751_v47 = vpop.f32.mrf.mxu0  ;;  %v1792_v48 = vpop.f32.mrf.mxu1 }
 0x868   :  { %v1807_v4 = vrot.slane %v1799_v45, %v2886_v2  ;;  %v1814_v49 = vrot.slane %v1800_v46, %v2886_v2  ;;  %v2496_v48 = vld [vmem:[%s3223_s12 + $0x8] sm:$0xff]  }
 0x869   :  { %v1752_v5 = vpop.f32.mrf.mxu0  ;;  %v1793_v50 = vpop.f32.mrf.mxu1 }
 0x86a   :  { %v1815_v51 = vcombine.low %v1807_v4, %v1814_v49  ;;  %v2497_v4 = vld [vmem:[%s3223_s12] sm:$0xff]  }
 0x86c   :  { %v1822_v39 = vrot.slane %v1815_v51, %v2886_v2 }
 0x86e   :  { %v1824_v53 = vadd.f32 %v1822_v39, %v1711_v52  ;;  %v2051_v39 = vld [vmem:[%s3221_s10] sm:$0x1]  ;;  %s2656_s10 = smov [#allocation9]  }
 0x86f   :  { %s2144_s12 = sshll.u32 %s2656_s10, 4  ;;  %s2145_s12 = int_to_ptr.vmem [resolvable:$true] %s2144_s12 }
 0x870   :  { %v2257_v54 = vmul.f32 -1.442695, %v1824_v53  ;;  %v1832_v57 = vrot.slane %v1824_v53, 3  ;;  %v2052_v53 = vld [vmem:[%s3222_s11] sm:$0x1]  ;;  %s2622_s11 = scalar_lea.vmem %s2145_s12, 16  ;;  %p2627_p11 = scmp.lt.s32.totalorder %s2145_s12, %s2145_s12 }
 0x871   :  { %p2623_p10 = scmp.ne.s32.totalorder %s2145_s12, %s2622_s11  ;;  %s2626_s24 = scalar_lea.vmem %s2145_s12, 32 }
 0x872   :  { %2554 = vpow2.f32 %v2257_v54  ;;  %p2628_p12 = scmp.lt.s32.totalorder %s2626_s24, %s2622_s11 }
 0x874   :  { %p2629_p13 = por %p2628_p12, %p2627_p11 }
 0x876   :  { %p2630_p0 = pnand %p2629_p13, %p2623_p10 }
 0x87f   :  { %v2555_v55 = vpop.eup %2554 }
 0x880   :  { %v1828_v56 = vadd.f32 1.0, %v2555_v55 }
 0x882   :  { %2556 = vrcp.f32 %v1828_v56 }
 0x883   :  { %2558 = vtanh.f32 %v1832_v57 }
 0x88f   :  { %v2557_v58 = vpop.eup %2556 }
 0x890   :  { %v1836_v63 = vrot.slane %v2557_v58, 1  ;;  %v2559_v0 = vpop.eup %2558  ;;  %v1842_v21 = vrot.slane %v2557_v58, 2 }
 0x891   :  { %v1839_v17 = vmul.f32 %v2559_v0, %v2557_v58  ;;  %v2078_v58 = vld [vmem:[#allocation3] sm:$0x1] }
 0x892   :  { %v1838_v59 = vmul.f32 %v1836_v63, %v3121_v13  ;;  %v1951_v13 = vld [vmem:[%s3217_s6] sm:$0x1] }
 0x894   :  { %v1840_v20 = vadd.f32 %v1839_v17, %v1838_v59 }
 0x896   :  { %2560 = vtanh.f32 %v1840_v20 }
 0x8a3   :  { %v2561_v22 = vpop.eup %2560 }
 0x8a4   :  { %v1844_v2 = vmul.f32 %v2561_v22, %v1842_v21 }
 0x8a6   :  { %v1845_v23 = vpack.c.bf16 %v1844_v2, %v1844_v2 }
 0x8a8   :  { %2308 = vmatmul.mubr.bf16.vlgmr.msra.gmra.mxu0 %v1845_v23 }
 0x968   :  { %v1945_v25 = vpop.f32.mrf.mxu0 }
 0x969   :  { %v1946_v26 = vadd.f32 %v1945_v25, %v1862_v24 }
 0x96a   :  { %v2309_v27 = vpop.f32.mrf.mxu0 }
 0x96b   :  { %v1954_v28 = vsel %vm1953_vm1, %v1946_v26, 0.0 }
 0x96c   :  { %1955 = vadd.xlane.f32.xlu0 %v1954_v28  ;;  %v1948_v29 = vpop.f32.mrf.mxu0 }
 0x96e   :  { %v2310_v30 = vpop.f32.mrf.mxu0 }
 0x9f5   :  { %v1956_v31 = vpop.xlane.xlu0 %1955 }
 0x9f6   :  { %v1958_v32 = vmul.f32 0.015625, %v1956_v31 }
 0x9f8   :  { %v1959_v33 = vsub.f32 %v1946_v26, %v1958_v32 }
 0x9fa   :  { %v1960_v34 = vmul.f32 %v1959_v33, %v1959_v33 }
 0x9fc   :  { %v1961_v35 = vsel %vm1953_vm1, %v1960_v34, 0.0 }
 0x9fd   :  { %1962 = vadd.xlane.f32.xlu0 %v1961_v35 }
 0xa86   :  { %v1963_v9 = vpop.xlane.xlu0 %1962 }
 0xa87   :  { %v1964_v10 = vmul.f32 0.015625, %v1963_v9 }
 0xa89   :  { %v1965_v11 = vadd.f32 1e-05, %v1964_v10 }
 0xa8b   :  { %2562 = vrsqrt.f32 %v1965_v11 }
 0xa98   :  { %v2563_v12 = vpop.eup %2562 }
 0xa99   :  { %v1967_v14 = vmul.f32 %v2563_v12, %v1959_v33 }
 0xa9b   :  { %v1968_v16 = vmul.f32 %v1967_v14, %v1951_v13 }
 0xa9d   :  { %v1969_v18 = vadd.f32 %v1968_v16, %v1952_v15 }
 0xa9f   :  { %vm1970_vm2 = vcmp.gt.f32.partialorder %v1969_v18, 0.0  ;;  %v1971_v19 = vmul.f32 0.01, %v1969_v18 }
 0xaa1   :  { %v1972_v60 = vsel %vm1970_vm2, %v1969_v18, %v1971_v19 }
 0xaa2   :  { %v1973_v61 = vpack.c.bf16 %v1972_v60, %v1972_v60 }
 0xaa4   :  { %2320 = vmatmul.mubr.msk.bf16.vlgmr.msra.gmra.mxu1 %vm2007_vm3, %v1973_v61 }
 0xaa5   :  { %2327 = vmatprep.mubr.msk.bf16.mxu1 %vm2655_vm0, %v2654_v62  ;;  %2324 = vmatpush3.bf16.msra.mxu1 %v2496_v48 }
 0xaa6   :  { %2325 = vmatprep.subr.bf16.mxu1 %v2654_v62 }
 0xaa9   :  { %2326 = vmatpush3.bf16.msra.mxu1 %v2497_v4 }
 0xb64   :  { %v2045_v3 = vpop.f32.mrf.mxu1 }
 0xb65   :  { %v2046_v6 = vadd.f32 %v2045_v3, %v1982_v1 }
 0xb66   :  { %v2321_v38 = vpop.f32.mrf.mxu1 }
 0xb67   :  { %v2054_v40 = vsel %vm2053_vm4, %v2046_v6, 0.0 }
 0xb68   :  { %2055 = vadd.xlane.f32.xlu1 %v2054_v40  ;;  %v2048_v41 = vpop.f32.mrf.mxu1 }
 0xb6a   :  { %v2322_v42 = vpop.f32.mrf.mxu1 }
 0xbf1   :  { %v2056_v43 = vpop.xlane.xlu1 %2055 }
 0xbf2   :  { %v2058_v44 = vmul.f32 0.03125, %v2056_v43 }
 0xbf4   :  { %v2059_v45 = vsub.f32 %v2046_v6, %v2058_v44 }
 0xbf6   :  { %v2060_v46 = vmul.f32 %v2059_v45, %v2059_v45 }
 0xbf8   :  { %v2061_v47 = vsel %vm2053_vm4, %v2060_v46, 0.0 }
 0xbf9   :  { %2062 = vadd.xlane.f32.xlu1 %v2061_v47 }
 0xc82   :  { %v2063_v49 = vpop.xlane.xlu1 %2062 }
 0xc83   :  { %v2064_v5 = vmul.f32 0.03125, %v2063_v49 }
 0xc85   :  { %v2065_v50 = vadd.f32 1e-05, %v2064_v5 }
 0xc87   :  { %2564 = vrsqrt.f32 %v2065_v50 }
 0xc94   :  { %v2565_v51 = vpop.eup %2564 }
 0xc95   :  { %v2067_v52 = vmul.f32 %v2565_v51, %v2059_v45 }
 0xc97   :  { %v2068_v54 = vmul.f32 %v2067_v52, %v2051_v39 }
 0xc99   :  { %v2069_v55 = vadd.f32 %v2068_v54, %v2052_v53 }
 0xc9b   :  { %vm2070_vm5 = vcmp.gt.f32.partialorder %v2069_v55, 0.0  ;;  %v2071_v56 = vmul.f32 0.01, %v2069_v55 }
 0xc9d   :  { %v2072_v62 = vsel %vm2070_vm5, %v2069_v55, %v2071_v56 }
 0xc9e   :  { %v2073_v57 = vpack.c.bf16 %v2072_v62, %v2072_v62 }
 0xca0   :  { %2328 = vmatmul.mubr.msk.bf16.vlgmr.msra.gmra.mxu1 %vm2091_vm6, %v2073_v57 }
 0xd60   :  { %v2129_v63 = vpop.f32.mrf.mxu1 }
 0xd61   :  { %v2130_v0 = vadd.f32 %v2129_v63, %v2078_v58 }
 0xd62   :  { %v2329_v59 = vpop.f32.mrf.mxu1 }
 0xd63   :  { %2566 = vtanh.f32 %v2130_v0 }
 0xd64   :  { %v2132_v17 = vpop.f32.mrf.mxu1 }
 0xd66   :  { %v2330_v20 = vpop.f32.mrf.mxu1 }
 0xd70   :  { %v2567_v21 = vpop.eup %2566 }
 0xd71   :  { %2137 = vst.msk [vmem:[#allocation9] sm:$0x1] %vm2136_vm7, %v2567_v21 }
 0xd72   :  { %2633 = shalt.err (!%p2630_p0)
}
 0xd73   :  { %2147 = dma.vmem_to_hbm [thread:$0]  %s2145_s12, 16, %s3225_s14, [#allocation6]  }
 0xd74   :  { %2646 = dma.done.wait [#allocation6], 16  }
 0xd75   :  { %2647 = vsyncadd [#allocation6], 4294967280 }
 0xd76   :  { %2151 = vsyncpa [#allocation5], 1 }
 0xd77   :  { %2152 = vsyncpa [#allocation8], 1 }
 0xd78   :  { %2153 = vsyncpa [#allocation6], 1 }

</bundles_post_ra>
